<compile_context>
chip_gen: v7x
topology: tpu7x:2x2x1
jax: 0.10.0
libtpu: 0.0.40
codegen_flags: <defaults>
</compile_context>

<pallas_src>
import jax
import jax.numpy as jnp
from jax.experimental import pallas as pl
from jax.experimental.pallas import tpu as pltpu

_EPS = 1e-5


def _make_dense_unit_kernel(W):
    """Kernel over a row-tile of R = images_per_tile * H * W flattened pixels."""

    def kernel(x_ref, s1_ref, b1_ref, w1_ref, b2_ref, w2_ref, mask_ref, o_ref):
        # x_ref:   (R, Cin)        f32   (NHWC-flattened rows)
        # s1/b1:   (1, Cin)        f32   (BN1 folded scale / bias)
        # w1_ref:  (Cin, mid)      bf16  (1x1 conv weight, BN2 scale pre-folded)
        # b2_ref:  (1, mid)        f32   (BN2 folded bias)
        # w2_ref:  (3, 3*mid, inc) bf16  (3x3 conv weight, K index = dx*mid + c)
        # mask_ref:(R, 9)          bf16  (per-row tap validity, zero padding)
        # o_ref:   (R, Cout)       f32   with Cout = Cin + inc
        R, Cin = x_ref.shape
        inc = w2_ref.shape[2]

        x = x_ref[...]                                        # (R, Cin) f32

        # Fused channel concat: identity occupies output lanes [0, Cin).
        o_ref[:, :Cin] = x

        # BN1 (folded) + ReLU, then 1x1 conv: stream R rows through the MXU
        # against the small stationed (Cin, mid) weight.  BN2's scale is
        # already folded into w1's columns, so only the bias remains.
        a1 = jnp.maximum(x * s1_ref[...] + b1_ref[...], 0.0)
        y = jnp.dot(a1.astype(jnp.bfloat16), w1_ref[...],
                    preferred_element_type=jnp.float32)       # (R, mid) f32
        a2 = jnp.maximum(y + b2_ref[...], 0.0)                # (R, mid) f32

        # 3x3 conv with zero padding: for each kernel row dy, build a
        # (R, 3*mid) patch from 3 sublane-rolled, boundary-masked taps and do
        # one accumulating matmul (K = 3*mid) against the stationed weights.
        z = jnp.zeros((R, inc), jnp.float32)
        for dy in range(3):
            taps = []
            for dx in range(3):
                k = dy * 3 + dx
                s = (dy - 1) * W + (dx - 1)        # flat spatial offset
                if s == 0:
                    shifted = a2
                else:
                    shifted = pltpu.roll(a2, (-s) % R, axis=0)
                tap = shifted.astype(jnp.bfloat16)
                if k != 4:                          # center tap mask is all 1s
                    tap = tap * mask_ref[:, k:k + 1]
                taps.append(tap)
            patch = jnp.concatenate(taps, axis=1)              # (R, 3*mid) bf16
            z = z + jnp.dot(patch, w2_ref[dy],
                            preferred_element_type=jnp.float32)

        o_ref[:, Cin:] = z.astype(o_ref.dtype)

    return kernel


def _row_bytes(Cin, Cout, mid, inc):
    """Rough per-row VMEM working set (double-buffered tiles + intermediates)."""
    return (2 * 4 * Cin          # x tile (f32, double buffered)
            + 2 * 4 * Cout       # out tile (f32, double buffered)
            + 2 * 2 * 9          # mask tile (bf16, double buffered)
            + 4 * Cin + 2 * Cin  # a1 (f32 + bf16)
            + 2 * 4 * mid        # y, a2 (f32)
            + 4 * 2 * mid        # rolled tap + 3-tap patch (bf16)
            + 2 * 4 * inc)       # z accumulator + store temp


def _pick_images_per_tile(N, L, row_bytes, budget=24 << 20):
    """Whole images per row-tile: >=512 rows when possible, within budget."""
    ipt = min(N, max(1, 512 // max(L, 1)))
    while ipt > 1 and ipt * L * row_bytes > budget:
        ipt -= 1
    # Multi-tile blocks need a sublane-aligned (multiple-of-8) row count.
    while ipt < N and (ipt * L) % 8 != 0:
        ipt += 1
    if (ipt * L) % 8 != 0:
        ipt = N                  # single full-array tile is always layout-legal
    return ipt


def _vmem_limit(tile_rows, row_bytes, weight_bytes):
    """Shape-aware scoped-VMEM limit, capped by the chip's physical VMEM."""
    need = tile_rows * row_bytes + 2 * weight_bytes + (4 << 20)
    limit = max(32 << 20, int(need))
    cap = 100 << 20
    try:
        cap = min(cap, int(0.75 * pltpu.get_tpu_info().vmem_capacity_bytes))
    except Exception:
        pass
    return int(min(limit, max(cap, 32 << 20)))


def dense_unit_forward(x_nchw, params):
    """DenseUnit forward. x_nchw: (N, Cin, H, W) f32 -> (N, Cin+inc, H, W)."""
    N, Cin, H, W = x_nchw.shape
    L = H * W
    w1 = params["w1"]                       # (Cin, mid)    = torch w1[m,c,0,0].T
    w2 = params["w2"]                       # (3,3,mid,inc) = torch w2[o,c,dy,dx] -> [dy,dx,c,o]
    mid = w1.shape[1]
    inc = w2.shape[3]
    Cout = Cin + inc

    # Fold BN (inference) into per-channel scale/bias.
    s1 = params["gamma1"] / jnp.sqrt(params["var1"] + _EPS)
    b1 = params["beta1"] - params["mean1"] * s1
    s2 = params["gamma2"] / jnp.sqrt(params["var2"] + _EPS)
    b2 = params["beta2"] - params["mean2"] * s2

    # Fold BN2's scale into conv1's output channels (f32, before bf16 cast).
    w1s = (w1 * s2[None, :]).astype(jnp.bfloat16)             # (Cin, mid)
    # 3x3 weight grouped per kernel row; K index = dx*mid + c.
    w2k = w2.reshape(3, 3 * mid, inc).astype(jnp.bfloat16)    # (3, 3*mid, inc)

    # Row tiling: whole images per tile so the roll+mask padding stays exact.
    row_bytes = _row_bytes(Cin, Cout, mid, inc)
    ipt = _pick_images_per_tile(N, L, row_bytes)
    n_pad = ((N + ipt - 1) // ipt) * ipt
    tile_rows = ipt * L
    num_tiles = n_pad // ipt

    # Layout plumbing: NCHW -> NHWC-flattened rows (batch+spatial folded).
    x_rows = jnp.transpose(x_nchw, (0, 2, 3, 1))              # (N, H, W, Cin)
    if n_pad != N:
        x_rows = jnp.pad(x_rows, ((0, n_pad - N), (0, 0), (0, 0), (0, 0)))
    x_rows = x_rows.reshape(n_pad * L, Cin)

    # Per-row tap-validity masks (zero padding).  Every tile holds whole
    # images, so one (tile_rows, 9) mask is reused for all tiles.
    hh = jnp.arange(L, dtype=jnp.int32) // W
    ww = jnp.arange(L, dtype=jnp.int32) % W
    cols = []
    for dy in (-1, 0, 1):
        for dx in (-1, 0, 1):
            cols.append((hh + dy >= 0) & (hh + dy < H) &
                        (ww + dx >= 0) & (ww + dx < W))
    mask = jnp.stack(cols, axis=1).astype(jnp.bfloat16)       # (L, 9)
    mask = jnp.tile(mask, (ipt, 1))                           # (tile_rows, 9)

    weight_bytes = Cin * mid * 2 + 9 * mid * inc * 2 + (2 * Cin + mid) * 4
    vmem_limit = _vmem_limit(tile_rows, row_bytes, weight_bytes)

    out_rows = pl.pallas_call(
        _make_dense_unit_kernel(W),
        out_shape=jax.ShapeDtypeStruct((n_pad * L, Cout), x_nchw.dtype),
        grid=(num_tiles,),
        in_specs=[
            pl.BlockSpec((tile_rows, Cin), lambda t: (t, 0)),       # x rows
            pl.BlockSpec((1, Cin), lambda t: (0, 0)),               # scale1
            pl.BlockSpec((1, Cin), lambda t: (0, 0)),               # bias1
            pl.BlockSpec((Cin, mid), lambda t: (0, 0)),             # w1 (bf16)
            pl.BlockSpec((1, mid), lambda t: (0, 0)),               # bias2
            pl.BlockSpec((3, 3 * mid, inc), lambda t: (0, 0, 0)),   # w2 (bf16)
            pl.BlockSpec((tile_rows, 9), lambda t: (0, 0)),         # tap masks
        ],
        out_specs=pl.BlockSpec((tile_rows, Cout), lambda t: (t, 0)),
        compiler_params=pltpu.CompilerParams(
            dimension_semantics=("parallel",),
            vmem_limit_bytes=vmem_limit),
    )(x_rows, s1.reshape(1, Cin), b1.reshape(1, Cin), w1s,
      b2.reshape(1, mid), w2k, mask)

    # TODO(synk): dropout skipped (dropout_rate=0.0; identity in eval mode).
    out = out_rows.reshape(n_pad, H, W, Cout)[:N]
    return jnp.transpose(out, (0, 3, 1, 2))                   # back to NCHW


def _reference(x_nchw, p):
    """Pure-JAX f32 reference of the same forward pass (correctness check)."""
    s1 = p["gamma1"] / jnp.sqrt(p["var1"] + _EPS)
    b1 = p["beta1"] - p["mean1"] * s1
    a = jax.nn.relu(x_nchw * s1[None, :, None, None] + b1[None, :, None, None])
    y = jnp.einsum("nchw,cm->nmhw", a, p["w1"])

    s2 = p["gamma2"] / jnp.sqrt(p["var2"] + _EPS)
    b2 = p["beta2"] - p["mean2"] * s2
    a2 = jax.nn.relu(y * s2[None, :, None, None] + b2[None, :, None, None])
    a2p = jnp.pad(a2, ((0, 0), (0, 0), (1, 1), (1, 1)))
    H, W = x_nchw.shape[2], x_nchw.shape[3]
    inc = p["w2"].shape[3]
    z = jnp.zeros((x_nchw.shape[0], inc, H, W), jnp.float32)
    for dy in range(3):
        for dx in range(3):
            patch = a2p[:, :, dy:dy + H, dx:dx + W]
            z = z + jnp.einsum("nchw,co->nohw", patch, p["w2"][dy, dx])
    return jnp.concatenate([x_nchw, z], axis=1)


def _init_params(key, in_channels, out_channels):
    inc = out_channels - in_channels
    mid = inc * 4
    ks = jax.random.split(key, 10)
    params = {
        # BN1 (over in_channels)
        "gamma1": jax.random.uniform(ks[0], (in_channels,), jnp.float32, 0.5, 1.5),
        "beta1": 0.1 * jax.random.normal(ks[1], (in_channels,), jnp.float32),
        "mean1": 0.1 * jax.random.normal(ks[2], (in_channels,), jnp.float32),
        "var1": jax.random.uniform(ks[3], (in_channels,), jnp.float32, 0.5, 1.5),
        # conv1 1x1: PyTorch weight (mid, Cin, 1, 1) stored here as (Cin, mid)
        "w1": 0.1 * jax.random.normal(ks[4], (in_channels, mid), jnp.float32),
        # BN2 (over mid)
        "gamma2": jax.random.uniform(ks[5], (mid,), jnp.float32, 0.5, 1.5),
        "beta2": 0.1 * jax.random.normal(ks[6], (mid,), jnp.float32),
        "mean2": 0.1 * jax.random.normal(ks[7], (mid,), jnp.float32),
        "var2": jax.random.uniform(ks[8], (mid,), jnp.float32, 0.5, 1.5),
        # conv2 3x3: PyTorch weight (inc, mid, 3, 3) stored here as (3, 3, mid, inc)
        "w2": 0.1 * jax.random.normal(ks[9], (3, 3, mid, inc), jnp.float32),
    }
    return params


if __name__ == "__main__":
    # Small shapes consistent with the module: DenseUnit(16 -> 24), 8x8 spatial.
    N, Cin, Cout, H, W = 2, 16, 24, 8, 8
    key = jax.random.PRNGKey(0)
    kx, kp = jax.random.split(key)
    x = jax.random.normal(kx, (N, Cin, H, W), jnp.float32)
    params = _init_params(kp, Cin, Cout)

    out = jax.jit(dense_unit_forward)(x, params)
    out = jax.block_until_ready(out)

    assert out.shape == (N, Cout, H, W), out.shape

    # bf16 matmul operands (f32 accumulation) -> slightly looser tolerance vs
    # the pure-f32 reference.
    ref = _reference(x, params)
    max_err = float(jnp.max(jnp.abs(out - ref)))
    assert jnp.allclose(out, ref, rtol=2e-2, atol=2e-2), max_err

    print("KERNEL_OK")
</pallas_src>

<mosaic_0001>
module attributes {stable_mosaic.version = 11 : i64} {
  func.func @kernel(%arg0: i32, %arg1: memref<128x16xf32, #tpu.memory_space<vmem>>, %arg2: memref<1x16xf32, #tpu.memory_space<vmem>>, %arg3: memref<1x16xf32, #tpu.memory_space<vmem>>, %arg4: memref<16x32xbf16, #tpu.memory_space<vmem>>, %arg5: memref<1x32xf32, #tpu.memory_space<vmem>>, %arg6: memref<3x96x8xbf16, #tpu.memory_space<vmem>>, %arg7: memref<128x9xbf16, #tpu.memory_space<vmem>>, %arg8: memref<128x24xf32, #tpu.memory_space<vmem>>) attributes {dimension_semantics = [#tpu.dimension_semantics<parallel>], iteration_bounds = array<i64: 1>, scalar_prefetch = 0 : i64, scratch_operands = 0 : i64, tpu.core_type = #tpu.core_type<tc>, window_params = [{transform_indices = @transform_0, window_bounds = array<i64: 128, 16>}, {pipeline_mode = #tpu.pipeline_mode<synchronous>, transform_indices = @transform_1, window_bounds = array<i64: 1, 16>}, {pipeline_mode = #tpu.pipeline_mode<synchronous>, transform_indices = @transform_2, window_bounds = array<i64: 1, 16>}, {pipeline_mode = #tpu.pipeline_mode<synchronous>, transform_indices = @transform_3, window_bounds = array<i64: 16, 32>}, {pipeline_mode = #tpu.pipeline_mode<synchronous>, transform_indices = @transform_4, window_bounds = array<i64: 1, 32>}, {pipeline_mode = #tpu.pipeline_mode<synchronous>, transform_indices = @transform_5, window_bounds = array<i64: 3, 96, 8>}, {pipeline_mode = #tpu.pipeline_mode<synchronous>, transform_indices = @transform_6, window_bounds = array<i64: 128, 9>}, {transform_indices = @transform_7, window_bounds = array<i64: 128, 24>}]} {
    %c0 = arith.constant 0 : index
    %c0_0 = arith.constant 0 : index
    %0 = vector.load %arg1[%c0, %c0_0] : memref<128x16xf32, #tpu.memory_space<vmem>>, vector<128x16xf32>
    %c0_1 = arith.constant 0 : index
    %c0_2 = arith.constant 0 : index
    %1 = vector.load %arg8[%c0_1, %c0_2] : memref<128x24xf32, #tpu.memory_space<vmem>>, vector<128x16xf32>
    tpu.vector_store %arg8[%c0_1, %c0_2], %0 {strides = array<i32>} : memref<128x24xf32, #tpu.memory_space<vmem>>, vector<128x16xf32>,
    %c0_3 = arith.constant 0 : index
    %c0_4 = arith.constant 0 : index
    %2 = vector.load %arg2[%c0_3, %c0_4] : memref<1x16xf32, #tpu.memory_space<vmem>>, vector<1x16xf32>
    %3 = vector.broadcast %2 : vector<1x16xf32> to vector<128x16xf32>
    %4 = arith.mulf %0, %3 : vector<128x16xf32>
    %c0_5 = arith.constant 0 : index
    %c0_6 = arith.constant 0 : index
    %5 = vector.load %arg3[%c0_5, %c0_6] : memref<1x16xf32, #tpu.memory_space<vmem>>, vector<1x16xf32>
    %6 = vector.broadcast %5 : vector<1x16xf32> to vector<128x16xf32>
    %7 = arith.addf %4, %6 : vector<128x16xf32>
    %cst = arith.constant 0.000000e+00 : f32
    %8 = vector.broadcast %cst : f32 to vector<128x16xf32>
    %9 = arith.maximumf %7, %8 : vector<128x16xf32>
    %10 = arith.truncf %9 : vector<128x16xf32> to vector<128x16xbf16>
    %c0_7 = arith.constant 0 : index
    %c0_8 = arith.constant 0 : index
    %11 = vector.load %arg4[%c0_7, %c0_8] : memref<16x32xbf16, #tpu.memory_space<vmem>>, vector<16x32xbf16>
    %cst_9 = arith.constant dense<0.000000e+00> : vector<128x32xf32>
    %12 = tpu.matmul %10, %11, %cst_9 {dimension_numbers = #tpu.dot_dimension_numbers<[1], [0], [0], [1], [0, 0, 1, 1], [], []>} : vector<128x16xbf16>, vector<16x32xbf16>, vector<128x32xf32> -> vector<128x32xf32>
    %c0_10 = arith.constant 0 : index
    %c0_11 = arith.constant 0 : index
    %13 = vector.load %arg5[%c0_10, %c0_11] : memref<1x32xf32, #tpu.memory_space<vmem>>, vector<1x32xf32>
    %14 = vector.broadcast %13 : vector<1x32xf32> to vector<128x32xf32>
    %15 = arith.addf %12, %14 : vector<128x32xf32>
    %cst_12 = arith.constant 0.000000e+00 : f32
    %16 = vector.broadcast %cst_12 : f32 to vector<128x32xf32>
    %17 = arith.maximumf %15, %16 : vector<128x32xf32>
    %cst_13 = arith.constant 0.000000e+00 : f32
    %18 = vector.broadcast %cst_13 : f32 to vector<128x8xf32>
    %c9_i32 = arith.constant 9 : i32
    %19 = tpu.dynamic_rotate %17 by %c9_i32 dim 0 : vector<128x32xf32>, i32 -> vector<128x32xf32>
    %20 = arith.truncf %19 : vector<128x32xf32> to vector<128x32xbf16>
    %c0_14 = arith.constant 0 : index
    %c0_15 = arith.constant 0 : index
    %21 = vector.load %arg7[%c0_14, %c0_15] : memref<128x9xbf16, #tpu.memory_space<vmem>>, vector<128x1xbf16>
    %22 = vector.broadcast %21 : vector<128x1xbf16> to vector<128x32xbf16>
    %23 = arith.mulf %20, %22 : vector<128x32xbf16>
    %c8_i32 = arith.constant 8 : i32
    %24 = tpu.dynamic_rotate %17 by %c8_i32 dim 0 : vector<128x32xf32>, i32 -> vector<128x32xf32>
    %25 = arith.truncf %24 : vector<128x32xf32> to vector<128x32xbf16>
    %c0_16 = arith.constant 0 : index
    %c1 = arith.constant 1 : index
    %26 = vector.load %arg7[%c0_16, %c1] : memref<128x9xbf16, #tpu.memory_space<vmem>>, vector<128x1xbf16>
    %27 = vector.broadcast %26 : vector<128x1xbf16> to vector<128x32xbf16>
    %28 = arith.mulf %25, %27 : vector<128x32xbf16>
    %c7_i32 = arith.constant 7 : i32
    %29 = tpu.dynamic_rotate %17 by %c7_i32 dim 0 : vector<128x32xf32>, i32 -> vector<128x32xf32>
    %30 = arith.truncf %29 : vector<128x32xf32> to vector<128x32xbf16>
    %c0_17 = arith.constant 0 : index
    %c2 = arith.constant 2 : index
    %31 = vector.load %arg7[%c0_17, %c2] : memref<128x9xbf16, #tpu.memory_space<vmem>>, vector<128x1xbf16>
    %32 = vector.broadcast %31 : vector<128x1xbf16> to vector<128x32xbf16>
    %33 = arith.mulf %30, %32 : vector<128x32xbf16>
    %34 = tpu.concatenate %23, %28, %33 in 1 : vector<128x32xbf16>, vector<128x32xbf16>, vector<128x32xbf16> -> vector<128x96xbf16>
    %c0_18 = arith.constant 0 : index
    %c0_19 = arith.constant 0 : index
    %c0_20 = arith.constant 0 : index
    %35 = vector.load %arg6[%c0_18, %c0_19, %c0_20] : memref<3x96x8xbf16, #tpu.memory_space<vmem>>, vector<1x96x8xbf16>
    %36 = vector.shape_cast %35 : vector<1x96x8xbf16> to vector<96x8xbf16>
    %cst_21 = arith.constant dense<0.000000e+00> : vector<128x8xf32>
    %37 = tpu.matmul %34, %36, %cst_21 {dimension_numbers = #tpu.dot_dimension_numbers<[1], [0], [0], [1], [0, 0, 1, 1], [], []>} : vector<128x96xbf16>, vector<96x8xbf16>, vector<128x8xf32> -> vector<128x8xf32>
    %38 = arith.addf %18, %37 : vector<128x8xf32>
    %c1_i32 = arith.constant 1 : i32
    %39 = tpu.dynamic_rotate %17 by %c1_i32 dim 0 : vector<128x32xf32>, i32 -> vector<128x32xf32>
    %40 = arith.truncf %39 : vector<128x32xf32> to vector<128x32xbf16>
    %c0_22 = arith.constant 0 : index
    %c3 = arith.constant 3 : index
    %41 = vector.load %arg7[%c0_22, %c3] : memref<128x9xbf16, #tpu.memory_space<vmem>>, vector<128x1xbf16>
    %42 = vector.broadcast %41 : vector<128x1xbf16> to vector<128x32xbf16>
    %43 = arith.mulf %40, %42 : vector<128x32xbf16>
    %44 = arith.truncf %17 : vector<128x32xf32> to vector<128x32xbf16>
    %c127_i32 = arith.constant 127 : i32
    %45 = tpu.dynamic_rotate %17 by %c127_i32 dim 0 : vector<128x32xf32>, i32 -> vector<128x32xf32>
    %46 = arith.truncf %45 : vector<128x32xf32> to vector<128x32xbf16>
    %c0_23 = arith.constant 0 : index
    %c5 = arith.constant 5 : index
    %47 = vector.load %arg7[%c0_23, %c5] : memref<128x9xbf16, #tpu.memory_space<vmem>>, vector<128x1xbf16>
    %48 = vector.broadcast %47 : vector<128x1xbf16> to vector<128x32xbf16>
    %49 = arith.mulf %46, %48 : vector<128x32xbf16>
    %50 = tpu.concatenate %43, %44, %49 in 1 : vector<128x32xbf16>, vector<128x32xbf16>, vector<128x32xbf16> -> vector<128x96xbf16>
    %c1_24 = arith.constant 1 : index
    %c0_25 = arith.constant 0 : index
    %c0_26 = arith.constant 0 : index
    %51 = vector.load %arg6[%c1_24, %c0_25, %c0_26] : memref<3x96x8xbf16, #tpu.memory_space<vmem>>, vector<1x96x8xbf16>
    %52 = vector.shape_cast %51 : vector<1x96x8xbf16> to vector<96x8xbf16>
    %cst_27 = arith.constant dense<0.000000e+00> : vector<128x8xf32>
    %53 = tpu.matmul %50, %52, %cst_27 {dimension_numbers = #tpu.dot_dimension_numbers<[1], [0], [0], [1], [0, 0, 1, 1], [], []>} : vector<128x96xbf16>, vector<96x8xbf16>, vector<128x8xf32> -> vector<128x8xf32>
    %54 = arith.addf %38, %53 : vector<128x8xf32>
    %c121_i32 = arith.constant 121 : i32
    %55 = tpu.dynamic_rotate %17 by %c121_i32 dim 0 : vector<128x32xf32>, i32 -> vector<128x32xf32>
    %56 = arith.truncf %55 : vector<128x32xf32> to vector<128x32xbf16>
    %c0_28 = arith.constant 0 : index
    %c6 = arith.constant 6 : index
    %57 = vector.load %arg7[%c0_28, %c6] : memref<128x9xbf16, #tpu.memory_space<vmem>>, vector<128x1xbf16>
    %58 = vector.broadcast %57 : vector<128x1xbf16> to vector<128x32xbf16>
    %59 = arith.mulf %56, %58 : vector<128x32xbf16>
    %c120_i32 = arith.constant 120 : i32
    %60 = tpu.dynamic_rotate %17 by %c120_i32 dim 0 : vector<128x32xf32>, i32 -> vector<128x32xf32>
    %61 = arith.truncf %60 : vector<128x32xf32> to vector<128x32xbf16>
    %c0_29 = arith.constant 0 : index
    %c7 = arith.constant 7 : index
    %62 = vector.load %arg7[%c0_29, %c7] : memref<128x9xbf16, #tpu.memory_space<vmem>>, vector<128x1xbf16>
    %63 = vector.broadcast %62 : vector<128x1xbf16> to vector<128x32xbf16>
    %64 = arith.mulf %61, %63 : vector<128x32xbf16>
    %c119_i32 = arith.constant 119 : i32
    %65 = tpu.dynamic_rotate %17 by %c119_i32 dim 0 : vector<128x32xf32>, i32 -> vector<128x32xf32>
    %66 = arith.truncf %65 : vector<128x32xf32> to vector<128x32xbf16>
    %c0_30 = arith.constant 0 : index
    %c8 = arith.constant 8 : index
    %67 = vector.load %arg7[%c0_30, %c8] : memref<128x9xbf16, #tpu.memory_space<vmem>>, vector<128x1xbf16>
    %68 = vector.broadcast %67 : vector<128x1xbf16> to vector<128x32xbf16>
    %69 = arith.mulf %66, %68 : vector<128x32xbf16>
    %70 = tpu.concatenate %59, %64, %69 in 1 : vector<128x32xbf16>, vector<128x32xbf16>, vector<128x32xbf16> -> vector<128x96xbf16>
    %c2_31 = arith.constant 2 : index
    %c0_32 = arith.constant 0 : index
    %c0_33 = arith.constant 0 : index
    %71 = vector.load %arg6[%c2_31, %c0_32, %c0_33] : memref<3x96x8xbf16, #tpu.memory_space<vmem>>, vector<1x96x8xbf16>
    %72 = vector.shape_cast %71 : vector<1x96x8xbf16> to vector<96x8xbf16>
    %cst_34 = arith.constant dense<0.000000e+00> : vector<128x8xf32>
    %73 = tpu.matmul %70, %72, %cst_34 {dimension_numbers = #tpu.dot_dimension_numbers<[1], [0], [0], [1], [0, 0, 1, 1], [], []>} : vector<128x96xbf16>, vector<96x8xbf16>, vector<128x8xf32> -> vector<128x8xf32>
    %74 = arith.addf %54, %73 : vector<128x8xf32>
    %c0_35 = arith.constant 0 : index
    %c16 = arith.constant 16 : index
    %75 = vector.load %arg8[%c0_35, %c16] : memref<128x24xf32, #tpu.memory_space<vmem>>, vector<128x8xf32>
    tpu.vector_store %arg8[%c0_35, %c16], %74 {strides = array<i32>} : memref<128x24xf32, #tpu.memory_space<vmem>>, vector<128x8xf32>,
    return
  }
  func.func @transform_0(%arg0: i32) -> (i32, i32) {
    %c0_i32 = arith.constant 0 : i32
    %c0_i32_0 = arith.constant 0 : i32
    return %arg0, %c0_i32 : i32, i32
  }
  func.func @transform_1(%arg0: i32) -> (i32, i32) {
    %c0_i32 = arith.constant 0 : i32
    %c0_i32_0 = arith.constant 0 : i32
    %c0_i32_1 = arith.constant 0 : i32
    return %c0_i32, %c0_i32_0 : i32, i32
  }
  func.func @transform_2(%arg0: i32) -> (i32, i32) {
    %c0_i32 = arith.constant 0 : i32
    %c0_i32_0 = arith.constant 0 : i32
    %c0_i32_1 = arith.constant 0 : i32
    return %c0_i32, %c0_i32_0 : i32, i32
  }
  func.func @transform_3(%arg0: i32) -> (i32, i32) {
    %c0_i32 = arith.constant 0 : i32
    %c0_i32_0 = arith.constant 0 : i32
    %c0_i32_1 = arith.constant 0 : i32
    return %c0_i32, %c0_i32_0 : i32, i32
  }
  func.func @transform_4(%arg0: i32) -> (i32, i32) {
    %c0_i32 = arith.constant 0 : i32
    %c0_i32_0 = arith.constant 0 : i32
    %c0_i32_1 = arith.constant 0 : i32
    return %c0_i32, %c0_i32_0 : i32, i32
  }
  func.func @transform_5(%arg0: i32) -> (i32, i32, i32) {
    %c0_i32 = arith.constant 0 : i32
    %c0_i32_0 = arith.constant 0 : i32
    %c0_i32_1 = arith.constant 0 : i32
    %c0_i32_2 = arith.constant 0 : i32
    return %c0_i32, %c0_i32_0, %c0_i32_1 : i32, i32, i32
  }
  func.func @transform_6(%arg0: i32) -> (i32, i32) {
    %c0_i32 = arith.constant 0 : i32
    %c0_i32_0 = arith.constant 0 : i32
    %c0_i32_1 = arith.constant 0 : i32
    return %c0_i32, %c0_i32_0 : i32, i32
  }
  func.func @transform_7(%arg0: i32) -> (i32, i32) {
    %c0_i32 = arith.constant 0 : i32
    %c0_i32_0 = arith.constant 0 : i32
    return %arg0, %c0_i32 : i32, i32
  }
}

</mosaic_0001>

<bundles_post_ra>
// kernel: dense_unit_forward.1
= control target key start
LH: loop header
LB: loop body
LE: loop exit
PB: predicated region body
PF: predicated region fallthrough
CT: control target
= control target key end

     0   :  { %v3611_v3 = vmov 0   ;;  %vm44_vm0 = vcmask 130048   ;;  %s5374_s0 = inlined_call_operand.vmem [shape: f32[128,16], index: 0, kind: input, shape index: {}]   ;;  %s5375_s1 = inlined_call_operand.vmem [shape: f32[1,16], index: 1, kind: input, shape index: {}]   ;;  %s5376_s2 = inlined_call_operand.vmem [shape: f32[1,16], index: 2, kind: input, shape index: {}]   ;;  %s5377_s3 = inlined_call_operand.vmem [shape: bf16[16,32], index: 3, kind: input, shape index: {}]   ;;  %s5378_s4 = inlined_call_operand.vmem [shape: f32[1,32], index: 4, kind: input, shape index: {}]   ;;  %s5379_s5 = inlined_call_operand.vmem [shape: bf16[3,96,8], index: 5, kind: input, shape index: {}]   ;;  %s5380_s6 = inlined_call_operand.vmem [shape: bf16[128,9], index: 6, kind: input, shape index: {}]   ;;  %s5381_s7 = inlined_call_operand.hbm [shape: f32[128,24], index: 7, kind: output, shape index: {}]  }
   0x1   :  { %v3669_v0 = vld [vmem:[%s5380_s6 + $0x8] sm:$0xf]  ;;  %v3674_v1 = vld [vmem:[%s5380_s6] sm:$0xf]  ;;  %3507 = vset.pattern.permute.xlu1 %v3611_v3  ;;  %3506 = vset.pattern.permute.xlu0 %v3611_v3  ;;  %v3682_v4 = vld [vmem:[%s5380_s6 + $0xc] sm:$0xf] }
   0x2   :  { %v3551_v2 = vld [vmem:[%s5377_s3] sm:$0xff]   ;;  %368 = vperm.xlu1 %3507, %v3669_v0   ;;  %344 = vperm.xlu0 %3506, %v3674_v1   ;;  %v29_v6 = vld [vmem:[%s5374_s0 + $0x8] sm:$0xff]  ;;  %v30_v12 = vld [vmem:[%s5374_s0 + $0x10] sm:$0xff] }
   0x3   :  { %v28_v5 = vld [vmem:[%s5374_s0] sm:$0xff]  ;;  %3345 = vmatprep.subr.bf16.mxu0 %v3551_v2  ;;  %46 = vst.msk [vmem:[#allocation2 + $0x8] sm:$0xff] %vm44_vm0, %v29_v6  ;;  %v31_v13 = vld [vmem:[%s5374_s0 + $0x18] sm:$0xff]  ;;  %47 = vst.msk [vmem:[#allocation2 + $0x10] sm:$0xff] %vm44_vm0, %v30_v12 }
   0x4   :  { %v3695_v7 = vld [vmem:[%s5380_s6 + $0x4] sm:$0xf]  ;;  %v3700_v8 = vld [vmem:[%s5375_s1] ss:$0 sm:$0xff]  ;;  %45 = vst.msk [vmem:[#allocation2] sm:$0xff] %vm44_vm0, %v28_v5  ;;  %3346 = vmatpush3.bf16.msra.mxu0 %v3551_v2  ;;  %48 = vst.msk [vmem:[#allocation2 + $0x18] sm:$0xff] %vm44_vm0, %v31_v13 }
   0x5   :  { %v3705_v9 = vld [vmem:[%s5376_s2] ss:$0 sm:$0xff]  ;;  %v68_v10 = vmul.f32 %v3700_v8, %v28_v5  ;;  %v69_v11 = vmul.f32 %v3700_v8, %v29_v6  ;;  %v70_v14 = vmul.f32 %v3700_v8, %v30_v12  ;;  %v71_v15 = vmul.f32 %v3700_v8, %v31_v13  ;;  %v3731_v19 = vld [vmem:[%s5380_s6 + $0x14] sm:$0xf]  ;;  %v33_v20 = vld [vmem:[%s5374_s0 + $0x28] sm:$0xff] }
   0x6   :  { %v32_v16 = vld [vmem:[%s5374_s0 + $0x20] sm:$0xff]  ;;  %380 = vperm.xlu1 %3507, %v3682_v4   ;;  %356 = vperm.xlu0 %3506, %v3695_v7   ;;  %v3741_v22 = vld [vmem:[%s5380_s6 + $0x10] sm:$0xf]  ;;  %v73_v25 = vmul.f32 %v3700_v8, %v33_v20  ;;  %50 = vst.msk [vmem:[#allocation2 + $0x28] sm:$0xff] %vm44_vm0, %v33_v20  ;;  %v35_v27 = vld [vmem:[%s5374_s0 + $0x38] sm:$0xff] }
   0x7   :  { %v91_v17 = vadd.f32 %v3705_v9, %v68_v10  ;;  %v92_v18 = vadd.f32 %v3705_v9, %v69_v11  ;;  %v72_v21 = vmul.f32 %v3700_v8, %v32_v16  ;;  %49 = vst.msk [vmem:[#allocation2 + $0x20] sm:$0xff] %vm44_vm0, %v32_v16  ;;  %v93_v23 = vadd.f32 %v3705_v9, %v70_v14  ;;  %v34_v26 = vld [vmem:[%s5374_s0 + $0x30] sm:$0xff]  ;;  %v36_v32 = vld [vmem:[%s5374_s0 + $0x40] sm:$0xff]  ;;  %v37_v33 = vld [vmem:[%s5374_s0 + $0x48] sm:$0xff] }
   0x8   :  { %v94_v24 = vadd.f32 %v3705_v9, %v71_v15  ;;  %v74_v31 = vmul.f32 %v3700_v8, %v34_v26  ;;  %51 = vst.msk [vmem:[#allocation2 + $0x30] sm:$0xff] %vm44_vm0, %v34_v26  ;;  %52 = vst.msk [vmem:[#allocation2 + $0x38] sm:$0xff] %vm44_vm0, %v35_v27  ;;  %v96_v36 = vadd.f32 %v3705_v9, %v73_v25  ;;  %v3772_v39 = vld [vmem:[%s5380_s6 + $0x1c] sm:$0xf]  ;;  %v38_v43 = vld [vmem:[%s5374_s0 + $0x50] sm:$0xff] }
   0x9   :  { %v107_v28 = vmax.f32 %v91_v17, 0.0  ;;  %v108_v29 = vmax.f32 %v92_v18, 0.0  ;;  %v95_v30 = vadd.f32 %v3705_v9, %v72_v21  ;;  %v109_v34 = vmax.f32 %v93_v23, 0.0  ;;  %53 = vst.msk [vmem:[#allocation2 + $0x40] sm:$0xff] %vm44_vm0, %v36_v32  ;;  %54 = vst.msk [vmem:[#allocation2 + $0x48] sm:$0xff] %vm44_vm0, %v37_v33  ;;  %v39_v44 = vld [vmem:[%s5374_s0 + $0x58] sm:$0xff] }
   0xa   :  { %v110_v35 = vmax.f32 %v94_v24, 0.0  ;;  %v75_v37 = vmul.f32 %v3700_v8, %v35_v27  ;;  %404 = vperm.xlu1 %3507, %v3731_v19   ;;  %392 = vperm.xlu0 %3506, %v3741_v22   ;;  %v97_v41 = vadd.f32 %v3705_v9, %v74_v31  ;;  %v76_v42 = vmul.f32 %v3700_v8, %v36_v32  ;;  %v3785_v46 = vld [vmem:[%s5380_s6 + $0x18] sm:$0xf]  ;;  %v40_v50 = vld [vmem:[%s5374_s0 + $0x60] sm:$0xff]  ;;  %v41_v51 = vld [vmem:[%s5374_s0 + $0x68] sm:$0xff] }
   0xb   :  { %v123_v38 = vpack.c.bf16 %v108_v29, %v107_v28  ;;  %v111_v40 = vmax.f32 %v95_v30, 0.0  ;;  %v112_v47 = vmax.f32 %v96_v36, 0.0  ;;  %v77_v49 = vmul.f32 %v3700_v8, %v37_v33  ;;  %55 = vst.msk [vmem:[#allocation2 + $0x50] sm:$0xff] %vm44_vm0, %v38_v43  ;;  %56 = vst.msk [vmem:[#allocation2 + $0x58] sm:$0xff] %vm44_vm0, %v39_v44  ;;  %v42_v56 = vld [vmem:[%s5374_s0 + $0x70] sm:$0xff]  ;;  %v43_v57 = vld [vmem:[%s5374_s0 + $0x78] sm:$0xff] }
   0xc   :  { %v124_v45 = vpack.c.bf16 %v110_v35, %v109_v34  ;;  %v98_v48 = vadd.f32 %v3705_v9, %v75_v37  ;;  %v113_v52 = vmax.f32 %v97_v41, 0.0  ;;  %v99_v53 = vadd.f32 %v3705_v9, %v76_v42  ;;  %57 = vst.msk [vmem:[#allocation2 + $0x60] sm:$0xff] %vm44_vm0, %v40_v50  ;;  %58 = vst.msk [vmem:[#allocation2 + $0x68] sm:$0xff] %vm44_vm0, %v41_v51  ;;  %v3813_v59 = vld [vmem:[%s5380_s6 + $0x24] sm:$0xf] }
   0xd   :  { %3347 = vmatprep.mubr.msk.bf16.mxu0 %vm44_vm0, %v123_v38  ;;  %v78_v54 = vmul.f32 %v3700_v8, %v38_v43  ;;  %v79_v55 = vmul.f32 %v3700_v8, %v39_v44  ;;  %v125_v58 = vpack.c.bf16 %v112_v47, %v111_v40  ;;  %v100_v61 = vadd.f32 %v3705_v9, %v77_v49  ;;  %v3824_v63 = vld [vmem:[%s5380_s6 + $0x20] sm:$0xf]  ;;  %v3835_v14 = vld [vmem:[%s5380_s6 + $0x2c] sm:$0xf]  ;;  %v3842_v15 = vld [vmem:[%s5380_s6 + $0x28] sm:$0xf] }
   0xe   :  { %3348 = vmatmul.mubr.msk.bf16.vlgmr.msra.gmra.mrb[0].mxu0 %vm44_vm0, %v124_v45  ;;  %v114_v60 = vmax.f32 %v98_v48, 0.0  ;;  %v80_v62 = vmul.f32 %v3700_v8, %v40_v50  ;;  %59 = vst.msk [vmem:[#allocation2 + $0x70] sm:$0xff] %vm44_vm0, %v42_v56  ;;  %60 = vst.msk [vmem:[#allocation2 + $0x78] sm:$0xff] %vm44_vm0, %v43_v57  ;;  %428 = vperm.xlu1 %3507, %v3772_v39   ;;  %v81_v2 = vmul.f32 %v3700_v8, %v41_v51  ;;  %v3848_v23 = vld [vmem:[%s5380_s6 + $0x34] sm:$0xf] }
   0xf   :  { %416 = vperm.xlu0 %3506, %v3785_v46   ;;  %3351 = vmatprep.mubr.msk.bf16.mxu0 %vm44_vm0, %v125_v58  ;;  %v115_v3 = vmax.f32 %v99_v53, 0.0  ;;  %v116_v5 = vmax.f32 %v100_v61, 0.0  ;;  %v101_v6 = vadd.f32 %v3705_v9, %v78_v54  ;;  %v102_v10 = vadd.f32 %v3705_v9, %v79_v55  ;;  %v3853_v24 = vld [vmem:[%s5380_s6 + $0x30] sm:$0xf]  ;;  %v3863_v28 = vld [vmem:[%s5380_s6 + $0x3c] sm:$0xf] }
  0x10   :  { %v103_v11 = vadd.f32 %v3705_v9, %v80_v62  ;;  %v104_v12 = vadd.f32 %v3705_v9, %v81_v2  ;;  %v126_v13 = vpack.c.bf16 %v114_v60, %v113_v52  ;;  %v82_v25 = vmul.f32 %v3700_v8, %v42_v56 }
  0x11   :  { %v127_v16 = vpack.c.bf16 %v116_v5, %v115_v3  ;;  %v117_v17 = vmax.f32 %v101_v6, 0.0  ;;  %v118_v18 = vmax.f32 %v102_v10, 0.0  ;;  %v83_v26 = vmul.f32 %v3700_v8, %v43_v57  ;;  %v3872_v8 = vld [vmem:[%s5380_s6 + $0x38] sm:$0xf] }
  0x12   :  { %452 = vperm.xlu1 %3507, %v3813_v59   ;;  %v119_v20 = vmax.f32 %v103_v11, 0.0  ;;  %v120_v21 = vmax.f32 %v104_v12, 0.0  ;;  %v105_v29 = vadd.f32 %v3705_v9, %v82_v25 }
  0x13   :  { %440 = vperm.xlu0 %3506, %v3824_v63   ;;  %v128_v27 = vpack.c.bf16 %v118_v18, %v117_v17  ;;  %v106_v30 = vadd.f32 %v3705_v9, %v83_v26 }
  0x14   :  { %v129_v31 = vpack.c.bf16 %v120_v21, %v119_v20 }
  0x16   :  { %3352 = vmatmul.mubr.msk.bf16.gmra.mrb[4].mxu0 %vm44_vm0, %v126_v13  ;;  %476 = vperm.xlu1 %3507, %v3835_v14  }
  0x17   :  { %464 = vperm.xlu0 %3506, %v3842_v15   ;;  %3355 = vmatprep.mubr.msk.bf16.mxu0 %vm44_vm0, %v127_v16 }
  0x1a   :  { %500 = vperm.xlu1 %3507, %v3848_v23  }
  0x1b   :  { %488 = vperm.xlu0 %3506, %v3853_v24  }
  0x1c   :  { %12 = vsyncpa [#allocation3], 0  ;;  %v121_v32 = vmax.f32 %v105_v29, 0.0  ;;  %v122_v33 = vmax.f32 %v106_v30, 0.0  ;;  %v3612_v34 = vmov 1   ;;  %v3613_v35 = vmov 2  }
  0x1d   :  { %v3614_v36 = vmov 5   ;;  %v5386_v37 = vmov 7   ;;  %v5384_v43 = vmov 8   ;;  %v5382_v57 = vmov 3   ;;  %s3620_s20 = smov 64   ;;  %s3623_s9 = smov [#allocation2]  }
  0x1e   :  { %3356 = vmatmul.mubr.msk.bf16.gmra.mrb[8].mxu0 %vm44_vm0, %v128_v27  ;;  %524 = vperm.xlu1 %3507, %v3863_v28   ;;  %v130_v9 = vpack.c.bf16 %v122_v33, %v121_v32  ;;  %v4061_v27 = vld [vmem:[%s5378_s4] ss:$0 sm:$0xff]  ;;  %v299_v30 = vlaneseq  ;;  %v3618_v32 = vmov 839922192   ;;  %s3619_s4 = smov 32   ;;  %vm1151_vm3 = vcmask 261120  }
  0x1f   :  { %512 = vperm.xlu0 %3506, %v3872_v8   ;;  %3359 = vmatprep.mubr.msk.bf16.mxu0 %vm44_vm0, %v129_v31  ;;  %v348_v33 = vunpack.c.l.s4 %v3618_v32  ;;  %vm1176_vm4 = vcmask 523264   ;;  %vm1830_vm5 = vcmask 785408   ;;  %vm3119_vm6 = vcmask 195712   ;;  %s3141_s10 = sshll.u32 %s3623_s9, 4  ;;  %s3142_s10 = int_to_ptr.vmem [resolvable:$true] %s3141_s10 }
  0x20   :  { %s3587_s11 = scalar_lea.vmem %s3142_s10, 2048  ;;  %p3592_p1 = scmp.lt.s32.totalorder %s3142_s10, %s3142_s10 }
  0x21   :  { %p3588_p0 = scmp.ne.s32.totalorder %s3142_s10, %s3587_s11  ;;  %p3593_p2 = scmp.lt.s32.totalorder %s3587_s11, %s3587_s11 }
  0x22   :  { %3509 = vset.pattern.permute.xlu1 %v3612_v34 }
  0x23   :  { %3508 = vset.pattern.permute.xlu0 %v3612_v34  ;;  %610 = vperm.xlu1 %3509, %v3695_v7   ;;  %p3594_p3 = por %p3593_p2, %p3592_p1 }
  0x24   :  { %599 = vperm.xlu0 %3508, %v3674_v1  }
  0x25   :  { %p3595_p4 = pnand %p3594_p3, %p3588_p0 }
  0x26   :  { %3360 = vmatmul.mubr.msk.bf16.gmra.mrb[12].mxu0 %vm44_vm0, %v130_v9 }
  0x27   :  { %621 = vperm.xlu1 %3509, %v3669_v0  }
  0x28   :  { %632 = vperm.xlu0 %3508, %v3682_v4  }
  0x2b   :  { %643 = vperm.xlu1 %3509, %v3741_v22  }
  0x2c   :  { %654 = vperm.xlu0 %3508, %v3731_v19  }
  0x2f   :  { %665 = vperm.xlu1 %3509, %v3785_v46  }
  0x30   :  { %676 = vperm.xlu0 %3508, %v3772_v39  }
  0x33   :  { %687 = vperm.xlu1 %3509, %v3824_v63  }
  0x34   :  { %698 = vperm.xlu0 %3508, %v3813_v59  }
  0x37   :  { %709 = vperm.xlu1 %3509, %v3842_v15  }
  0x38   :  { %720 = vperm.xlu0 %3508, %v3835_v14  }
  0x3b   :  { %731 = vperm.xlu1 %3509, %v3853_v24  }
  0x3c   :  { %742 = vperm.xlu0 %3508, %v3848_v23  }
  0x3f   :  { %753 = vperm.xlu1 %3509, %v3872_v8  }
  0x40   :  { %764 = vperm.xlu0 %3508, %v3863_v28  }
  0x43   :  { %3510 = vset.pattern.permute.xlu1 %v3613_v35 }
  0x44   :  { %3511 = vset.pattern.permute.xlu0 %v3613_v35  ;;  %872 = vperm.xlu1 %3510, %v3674_v1  }
  0x45   :  { %883 = vperm.xlu0 %3511, %v3695_v7  }
  0x48   :  { %894 = vperm.xlu1 %3510, %v3669_v0  }
  0x49   :  { %916 = vperm.xlu0 %3511, %v3741_v22  }
  0x4c   :  { %905 = vperm.xlu1 %3510, %v3682_v4  }
  0x4d   :  { %938 = vperm.xlu0 %3511, %v3785_v46  }
  0x50   :  { %927 = vperm.xlu1 %3510, %v3731_v19  }
  0x51   :  { %960 = vperm.xlu0 %3511, %v3824_v63  }
  0x54   :  { %949 = vperm.xlu1 %3510, %v3772_v39  }
  0x55   :  { %982 = vperm.xlu0 %3511, %v3842_v15  }
  0x58   :  { %971 = vperm.xlu1 %3510, %v3813_v59  }
  0x59   :  { %1004 = vperm.xlu0 %3511, %v3853_v24  }
  0x5c   :  { %993 = vperm.xlu1 %3510, %v3835_v14  }
  0x5d   :  { %1026 = vperm.xlu0 %3511, %v3872_v8  }
  0x60   :  { %1015 = vperm.xlu1 %3510, %v3848_v23  }
  0x61   :  { %3513 = vset.pattern.permute.xlu0 %v3614_v36 }
  0x62   :  { %1473 = vperm.xlu0 %3513, %v3695_v7  }
  0x64   :  { %1037 = vperm.xlu1 %3510, %v3863_v28  }
  0x66   :  { %1517 = vperm.xlu0 %3513, %v3731_v19  }
  0x68   :  { %3512 = vset.pattern.permute.xlu1 %v3614_v36 }
  0x69   :  { %1462 = vperm.xlu1 %3512, %v3674_v1  }
  0x6a   :  { %1539 = vperm.xlu0 %3513, %v3772_v39  }
  0x6d   :  { %1484 = vperm.xlu1 %3512, %v3669_v0  }
  0x6e   :  { %1561 = vperm.xlu0 %3513, %v3813_v59  }
  0x71   :  { %1495 = vperm.xlu1 %3512, %v3682_v4  }
  0x72   :  { %1583 = vperm.xlu0 %3513, %v3835_v14  }
  0x75   :  { %3514 = vset.pattern.permute.xlu1 %v5386_v37 }
  0x76   :  { %1605 = vperm.xlu0 %3513, %v3848_v23   ;;  %2337 = vperm.xlu1 %3514, %v3695_v7  }
  0x7a   :  { %1627 = vperm.xlu0 %3513, %v3863_v28   ;;  %3515 = vset.pattern.permute.xlu1 %v3614_v36 }
  0x7b   :  { %1506 = vperm.xlu1 %3515, %v3741_v22  }
  0x7e   :  { %3531 = vset.pattern.permute.xlu0 %v5386_v37 }
  0x7f   :  { %2326 = vperm.xlu0 %3531, %v3674_v1   ;;  %3516 = vset.pattern.permute.xlu1 %v5386_v37 }
  0x80   :  { %2348 = vperm.xlu1 %3516, %v3669_v0  }
  0x81   :  { %v3931_v38 = vpop.permute.xlu1 %368  ;;  %v3933_v40 = vpop.permute.xlu0 %344 }
  0x82   :  { %5446 = vst [vmem:[#allocation5_spill] sm:$0xff] %v3931_v38  ;;  %5447 = vst [vmem:[#allocation6_spill] sm:$0xff] %v3933_v40  ;;  %v4077_v38 = vshrl.u32 %v299_v30, 7 }
  0x83   :  { %2370 = vperm.xlu0 %3531, %v3741_v22  }
  0x84   :  { %2359 = vperm.xlu1 %3516, %v3682_v4   ;;  %vm846_vm1 = vcmp.lt.s32.totalorder %v4077_v38, 7  ;;  %vm301_vm2 = vcmp.lt.s32.totalorder %v4077_v38, 1 }
  0x85   :  { %v3937_v41 = vpop.permute.xlu1 %380  ;;  %v3939_v42 = vpop.permute.xlu0 %356 }
  0x86   :  { %5448 = vst [vmem:[#allocation7_spill] sm:$0xff] %v3937_v41  ;;  %5449 = vst [vmem:[#allocation8_spill] sm:$0xff] %v3939_v42 }
  0x87   :  { %2414 = vperm.xlu0 %3531, %v3824_v63  }
  0x88   :  { %3517 = vset.pattern.permute.xlu1 %v5384_v43 }
  0x89   :  { %v3943_v44 = vpop.permute.xlu1 %404  ;;  %2569 = vperm.xlu1 %3517, %v3695_v7   ;;  %v3946_v45 = vpop.permute.xlu0 %392 }
  0x8a   :  { %5450 = vst [vmem:[#allocation9_spill] sm:$0xff] %v3943_v44  ;;  %5451 = vst [vmem:[#allocation10_spill] sm:$0xff] %v3946_v45 }
  0x8b   :  { %2458 = vperm.xlu0 %3531, %v3853_v24  }
  0x8d   :  { %v3949_v47 = vpop.permute.xlu1 %428  ;;  %3518 = vset.pattern.permute.xlu1 %v3614_v36 }
  0x8e   :  { %5452 = vst [vmem:[#allocation11_spill] sm:$0xff] %v3949_v47  ;;  %v3952_v48 = vpop.permute.xlu0 %416  ;;  %1528 = vperm.xlu1 %3518, %v3785_v46  }
  0x8f   :  { %5453 = vst [vmem:[#allocation12_spill] sm:$0xff] %v3952_v48  ;;  %2491 = vperm.xlu0 %3531, %v3863_v28  }
  0x91   :  { %v3956_v49 = vpop.permute.xlu1 %452 }
  0x92   :  { %5454 = vst [vmem:[#allocation13_spill] sm:$0xff] %v3956_v49  ;;  %v3958_v50 = vpop.permute.xlu0 %440  ;;  %3519 = vset.pattern.permute.xlu1 %v5384_v43 }
  0x93   :  { %5455 = vst [vmem:[#allocation14_spill] sm:$0xff] %v3958_v50  ;;  %3534 = vset.pattern.permute.xlu0 %v5384_v43  ;;  %2580 = vperm.xlu1 %3519, %v3669_v0  }
  0x94   :  { %2558 = vperm.xlu0 %3534, %v3674_v1  }
  0x95   :  { %v3964_v51 = vpop.permute.xlu1 %476 }
  0x96   :  { %5456 = vst [vmem:[#allocation15_spill] sm:$0xff] %v3964_v51  ;;  %v3966_v52 = vpop.permute.xlu0 %464 }
  0x97   :  { %5457 = vst [vmem:[#allocation16_spill] sm:$0xff] %v3966_v52  ;;  %2591 = vperm.xlu1 %3519, %v3682_v4  }
  0x98   :  { %2602 = vperm.xlu0 %3534, %v3741_v22  }
  0x99   :  { %v3970_v53 = vpop.permute.xlu1 %500 }
  0x9a   :  { %5458 = vst [vmem:[#allocation17_spill] sm:$0xff] %v3970_v53  ;;  %v3972_v54 = vpop.permute.xlu0 %488 }
  0x9b   :  { %5459 = vst [vmem:[#allocation18_spill] sm:$0xff] %v3972_v54  ;;  %3520 = vset.pattern.permute.xlu1 %v5386_v37 }
  0x9c   :  { %2646 = vperm.xlu0 %3534, %v3824_v63   ;;  %2381 = vperm.xlu1 %3520, %v3731_v19  }
  0x9d   :  { %v3977_v0 = vpop.permute.xlu1 %524 }
  0x9e   :  { %5460 = vst [vmem:[#allocation19_spill] sm:$0xff] %v3977_v0  ;;  %v3979_v55 = vpop.permute.xlu0 %512 }
  0x9f   :  { %5461 = vst [vmem:[#allocation20_spill] sm:$0xff] %v3979_v55 }
  0xa0   :  { %2701 = vperm.xlu0 %3534, %v3848_v23   ;;  %3521 = vset.pattern.permute.xlu1 %v3614_v36 }
  0xa1   :  { %1550 = vperm.xlu1 %3521, %v3824_v63  }
  0xa2   :  { %v3984_v56 = vpop.permute.xlu1 %610 }
  0xa3   :  { %v3988_v58 = vpop.permute.xlu0 %599 }
  0xa4   :  { %3536 = vset.pattern.permute.xlu0 %v5382_v57 }
  0xa5   :  { %1214 = vperm.xlu0 %3536, %v3674_v1   ;;  %3522 = vset.pattern.permute.xlu1 %v5386_v37 }
  0xa6   :  { %v3991_v60 = vpop.permute.xlu1 %621  ;;  %2392 = vperm.xlu1 %3522, %v3785_v46  }
  0xa7   :  { %v3998_v62 = vpop.permute.xlu0 %632 }
  0xa9   :  { %1247 = vperm.xlu0 %3536, %v3682_v4  }
  0xaa   :  { %v3995_v61 = vpop.permute.xlu1 %643  ;;  %2403 = vperm.xlu1 %3522, %v3772_v39  }
  0xab   :  { %v4004_v1 = vpop.permute.xlu0 %654 }
  0xae   :  { %v4000_v63 = vpop.permute.xlu1 %665  ;;  %3523 = vset.pattern.permute.xlu1 %v5384_v43 }
  0xaf   :  { %2613 = vperm.xlu1 %3523, %v3731_v19   ;;  %v4012_v3 = vpop.permute.xlu0 %676 }
  0xb2   :  { %v4006_v2 = vpop.permute.xlu1 %687 }
  0xb3   :  { %3524 = vset.pattern.permute.xlu1 %v3614_v36  ;;  %v4018_v6 = vpop.permute.xlu0 %698 }
  0xb4   :  { %1572 = vperm.xlu1 %3524, %v3842_v15  }
  0xb6   :  { %v4010_v4 = vpop.permute.xlu1 %709 }
  0xb7   :  { %v4025_v10 = vpop.permute.xlu0 %720 }
  0xb8   :  { %3525 = vset.pattern.permute.xlu1 %v5384_v43 }
  0xb9   :  { %2624 = vperm.xlu1 %3525, %v3785_v46  }
  0xba   :  { %v4016_v5 = vpop.permute.xlu1 %731 }
  0xbb   :  { %v4033_v12 = vpop.permute.xlu0 %742 }
  0xbd   :  { %2635 = vperm.xlu1 %3525, %v3772_v39  }
  0xbe   :  { %v4021_v19 = vpop.permute.xlu1 %753 }
  0xbf   :  { %v4039_v16 = vpop.permute.xlu0 %764 }
  0xc1   :  { %3526 = vset.pattern.permute.xlu1 %v5386_v37 }
  0xc2   :  { %2425 = vperm.xlu1 %3526, %v3813_v59  }
  0xc3   :  { %v4027_v11 = vpop.permute.xlu1 %872 }
  0xc4   :  { %5462 = vst [vmem:[#allocation21_spill] sm:$0xff] %v4027_v11  ;;  %v4047_v20 = vpop.permute.xlu0 %883  ;;  %v5479_v11 = vmov 8  }
  0xc5   :  { %5465 = vst [vmem:[#allocation24_spill] sm:$0xff] %v4047_v20 }
  0xc6   :  { %3527 = vset.pattern.permute.xlu1 %v3614_v36 }
  0xc7   :  { %1594 = vperm.xlu1 %3527, %v3853_v24   ;;  %v4031_v46 = vpop.permute.xlu1 %894 }
  0xc8   :  { %5463 = vst [vmem:[#allocation22_spill] sm:$0xff] %v4031_v46  ;;  %v4052_v25 = vpop.permute.xlu0 %916 }
  0xcb   :  { %3528 = vset.pattern.permute.xlu1 %v5386_v37  ;;  %v4036_v13 = vpop.permute.xlu1 %905 }
  0xcc   :  { %5464 = vst [vmem:[#allocation23_spill] sm:$0xff] %v4036_v13  ;;  %2436 = vperm.xlu1 %3528, %v3842_v15   ;;  %v4064_v29 = vpop.permute.xlu0 %938 }
  0xcf   :  { %v4041_v17 = vpop.permute.xlu1 %927 }
  0xd0   :  { %2447 = vperm.xlu1 %3528, %v3835_v14   ;;  %v4082_v55 = vpop.permute.xlu0 %960 }
  0xd3   :  { %v4044_v18 = vpop.permute.xlu1 %949 }
  0xd4   :  { %3529 = vset.pattern.permute.xlu1 %v5384_v43 }
  0xd5   :  { %2657 = vperm.xlu1 %3529, %v3813_v59  }
  0xd7   :  { %v4050_v21 = vpop.permute.xlu1 %971 }
  0xd9   :  { %3530 = vset.pattern.permute.xlu1 %v3614_v36 }
  0xda   :  { %1616 = vperm.xlu1 %3530, %v3872_v8  }
  0xdb   :  { %v4056_v26 = vpop.permute.xlu1 %993 }
  0xde   :  { %3532 = vset.pattern.permute.xlu1 %v5384_v43 }
  0xdf   :  { %2668 = vperm.xlu1 %3532, %v3842_v15   ;;  %v4067_v59 = vpop.permute.xlu1 %1015 }
  0xe1   :  { %v3349_v31 = vpop.f32.mrb[0].mxu0 }
  0xe2   :  { %v213_v9 = vadd.f32 %v3349_v31, %v4061_v27  ;;  %v204_v34 = vpop.f32.mrb[1].mxu0  ;;  %v349_v31 = vunpack.c.0.s8 %v348_v33 }
  0xe3   :  { %v205_v35 = vadd.f32 %v4061_v27, %v204_v34  ;;  %v3350_v36 = vpop.f32.mrb[2].mxu0  ;;  %2679 = vperm.xlu1 %3532, %v3835_v14   ;;  %v4075_v15 = vpop.permute.xlu1 %1037 }
  0xe4   :  { %v4071_v57 = vmax.f32 %v213_v9, 0.0  ;;  %v216_v43 = vadd.f32 %v3350_v36, %v4061_v27  ;;  %v207_v37 = vpop.f32.mrb[3].mxu0 }
  0xe5   :  { %v4079_v41 = vmax.f32 %v205_v35, 0.0  ;;  %v208_v32 = vadd.f32 %v4061_v27, %v207_v37  ;;  %v5467_v37 = vmov 7  }
  0xe6   :  { %v832_v34 = vrot.slane %v4071_v57, 1  ;;  %v4085_v9 = vmax.f32 %v216_v43, 0.0  ;;  %v5472_v46 = vrot.slane %v4071_v57, 7 }
  0xe7   :  { %v4088_v0 = vmax.f32 %v208_v32, 0.0  ;;  %3533 = vset.pattern.permute.xlu1 %v5467_v37  ;;  %v4109_v37 = vsub.s32 %v349_v31, %v4077_v38 }
  0xe8   :  { %v833_v35 = vrot.slane %v4085_v9, 1  ;;  %2469 = vperm.xlu1 %3533, %v3848_v23   ;;  %v4099_v32 = vpop.permute.xlu1 %1462  ;;  %v5471_v53 = vrot.slane %v4085_v9, 7 }
  0xe9   :  { %5466 = vst [vmem:[#allocation25_spill] sm:$0xff] %v4088_v0  ;;  %v831_v43 = vrot.slane %v4088_v0, 1  ;;  %v3353_v54 = vpop.f32.mrb[4].mxu0  ;;  %5468 = vst [vmem:[#allocation26_spill] sm:$0xff] %v4099_v32  ;;  %v4103_v36 = vpack.c.bf16 %v4071_v57, %v4088_v0  ;;  %v652_v50 = vrot.slane %v3995_v61, %v4109_v37 }
  0xea   :  { %v229_v33 = vadd.f32 %v3353_v54, %v4061_v27  ;;  %v220_v30 = vpop.f32.mrb[5].mxu0  ;;  %v4114_v23 = vsel %vm846_vm1, %v832_v34, %v833_v35  ;;  %v4122_v13 = vsel %vm301_vm2, %v5472_v46, %v5471_v53  ;;  %v5474_v54 = vrot.slane %v4079_v41, 1  ;;  %v4139_v46 = vpop.permute.xlu0 %982 }
  0xeb   :  { %5469 = vst [vmem:[#allocation27_spill] sm:$0xff] %v4103_v36  ;;  %5470 = vst [vmem:[#allocation28_spill] sm:$0xff] %v4114_v23  ;;  %v221_v14 = vadd.f32 %v4061_v27, %v220_v30  ;;  %v3354_v52 = vpop.f32.mrb[6].mxu0  ;;  %v4127_v31 = vsel %vm846_vm1, %v831_v43, %v832_v34  ;;  %v663_v53 = vrot.slane %v4004_v1, %v4109_v37 }
  0xec   :  { %5473 = vst [vmem:[#allocation29_spill] sm:$0xff] %v4127_v31  ;;  %v4133_v51 = vsel %vm846_vm1, %v5474_v54, %v831_v43  ;;  %v4141_v30 = vmax.f32 %v229_v33, 0.0  ;;  %v223_v49 = vpop.f32.mrb[7].mxu0  ;;  %2480 = vperm.xlu1 %3533, %v3872_v8   ;;  %v4149_v43 = vpop.permute.xlu1 %1484  ;;  %v4153_v61 = vpack.c.bf16 %v4114_v23, %v4127_v31  ;;  %v232_v54 = vadd.f32 %v3354_v52, %v4061_v27 }
  0xed   :  { %v4145_v48 = vmax.f32 %v221_v14, 0.0  ;;  %v224_v47 = vadd.f32 %v4061_v27, %v223_v49  ;;  %5475 = vst [vmem:[#allocation30_spill] sm:$0xff] %v4149_v43  ;;  %v3174_v20 = vcombine.low %v652_v50, %v663_v53  ;;  %v925_v1 = vrot.slane %v4052_v25, %v4109_v37 }
  0xee   :  { %5476 = vst [vmem:[#allocation31_spill] sm:$0xff] %v4153_v61  ;;  %v936_v52 = vrot.slane %v4041_v17, %v4109_v37  ;;  %v4188_v53 = vpop.permute.xlu0 %1004  ;;  %v4190_v40 = vmax.f32 %v232_v54, 0.0  ;;  %v707_v61 = vrot.slane %v4018_v6, %v4109_v37  ;;  %v729_v6 = vrot.slane %v4025_v10, %v4109_v37 }
  0xef   :  { %v834_v34 = vrot.slane %v4145_v48, 1  ;;  %v4164_v42 = vmax.f32 %v224_v47, 0.0  ;;  %v4172_v33 = vpack.c.bf16 %v4145_v48, %v4085_v9 }
  0xf0   :  { %3535 = vset.pattern.permute.xlu1 %v5479_v11  ;;  %v4182_v50 = vpop.permute.xlu1 %1495  ;;  %v696_v11 = vrot.slane %v4006_v2, %v4109_v37  ;;  %v3182_v23 = vcombine.low %v925_v1, %v936_v52  ;;  %v685_v1 = vrot.slane %v4012_v3, %v4109_v37 }
  0xf1   :  { %5477 = vst [vmem:[#allocation32_spill] sm:$0xff] %v4172_v33  ;;  %v4178_v14 = vpack.c.bf16 %v4141_v30, %v4164_v42  ;;  %v835_v47 = vrot.slane %v4164_v42, 1  ;;  %v3357_v49 = vpop.f32.mrb[8].mxu0  ;;  %5480 = vst [vmem:[#allocation34_spill] sm:$0xff] %v4182_v50  ;;  %v4186_v25 = vsel %vm846_vm1, %v833_v35, %v834_v34  ;;  %v824_v44 = vmul.bf16 %v3174_v20, %v4172_v33 }
  0xf2   :  { %5481 = vst [vmem:[#allocation35_spill] sm:$0xff] %v4186_v25  ;;  %v245_v17 = vadd.f32 %v3357_v49, %v4061_v27  ;;  %v236_v45 = vpop.f32.mrb[9].mxu0  ;;  %2690 = vperm.xlu1 %3535, %v3853_v24   ;;  %v5483_v49 = vrot.slane %v4141_v30, 1 }
  0xf3   :  { %5478 = vst [vmem:[#allocation33_spill] sm:$0xff] %v4178_v14  ;;  %v237_v35 = vadd.f32 %v4061_v27, %v236_v45  ;;  %v3358_v31 = vpop.f32.mrb[10].mxu0  ;;  %v4202_v54 = vsel %vm846_vm1, %v834_v34, %v835_v47  ;;  %1115 = vrot.lane.b32.xlu0 %v824_v44, %s3619_s4  ;;  %v4249_v44 = vpop.permute.xlu0 %1026 }
  0xf4   :  { %5482 = vst [vmem:[#allocation36_spill] sm:$0xff] %v4202_v54  ;;  %v4208_v20 = vsel %vm846_vm1, %v835_v47, %v5483_v49  ;;  %v4212_v24 = vmax.f32 %v245_v17, 0.0  ;;  %v248_v2 = vadd.f32 %v3358_v31, %v4061_v27  ;;  %v239_v45 = vpop.f32.mrb[11].mxu0  ;;  %v4218_v34 = vpack.c.bf16 %v4202_v54, %v4186_v25 }
  0xf5   :  { %5484 = vst [vmem:[#allocation37_spill] sm:$0xff] %v4208_v20  ;;  %v4220_v43 = vmax.f32 %v237_v35, 0.0  ;;  %v240_v47 = vadd.f32 %v4061_v27, %v239_v45  ;;  %v674_v17 = vrot.slane %v4000_v63, %v4109_v37  ;;  %v837_v31 = vrot.slane %v4190_v40, 1  ;;  %v4232_v25 = vpop.permute.xlu1 %2337  ;;  %v4243_v63 = vld [vmem:[%s5379_s5] sm:$0xff]  }
  0xf6   :  { %5485 = vst [vmem:[#allocation38_spill] sm:$0xff] %v4218_v34  ;;  %v4229_v49 = vmax.f32 %v248_v2, 0.0  ;;  %2712 = vperm.xlu1 %3535, %v3872_v8   ;;  %5486 = vst [vmem:[#allocation39_spill] sm:$0xff] %v4232_v25  ;;  %v1097_v45 = vmul.bf16 %v3182_v23, %v4218_v34  ;;  %v3176_v2 = vcombine.low %v696_v11, %v707_v61  ;;  %3447 = vmatprep.subr.bf16.mxu1 %v4243_v63 }
  0xf7   :  { %v838_v52 = vrot.slane %v4220_v43, 1  ;;  %v4237_v35 = vmax.f32 %v240_v47, 0.0  ;;  %5487 = vst [vmem:[#allocation40_spill] sm:$0xff] %v4243_v63  ;;  %v718_v8 = vrot.slane %v4010_v4, %v4109_v37  ;;  %v740_v47 = vrot.slane %v4016_v5, %v4109_v37  ;;  %3453 = vmatpush3.bf16.msra.mxu1 %v4243_v63 }
  0xf8   :  { %v5394_v3 = vrot.slane %v4229_v49, 1  ;;  %1139 = vrot.lane.b32.xlu0 %v1097_v45, %s3620_s20  ;;  %v4262_v10 = vpack.c.bf16 %v4220_v43, %v4190_v40  ;;  %v5490_v34 = vrot.slane %v4141_v30, 1  ;;  %v5492_v54 = vrot.slane %v4212_v24, 1 }
  0xf9   :  { %v4256_v23 = vpack.c.bf16 %v4212_v24, %v4237_v35  ;;  %v3361_v4 = vpop.f32.mrb[12].mxu0  ;;  %v4269_v5 = vsel %vm846_vm1, %v837_v31, %v838_v52  ;;  %v5503_v63 = vmov 3  }
  0xfa   :  { %5488 = vst [vmem:[#allocation41_spill] sm:$0xff] %v4262_v10  ;;  %v261_v11 = vadd.f32 %v3361_v4, %v4061_v27  ;;  %v252_v61 = vpop.f32.mrb[13].mxu0  ;;  %2723 = vperm.xlu1 %3535, %v3863_v28   ;;  %5489 = vst [vmem:[#allocation42_spill] sm:$0xff] %v4269_v5  ;;  %v4275_v45 = vsel %vm846_vm1, %v5490_v34, %v837_v31  ;;  %v4283_v4 = vsel %vm846_vm1, %v5492_v54, %v5394_v3  ;;  %v4289_v33 = vpop.permute.xlu1 %1506 }
  0xfb   :  { %5491 = vst [vmem:[#allocation43_spill] sm:$0xff] %v4275_v45  ;;  %5493 = vst [vmem:[#allocation44_spill] sm:$0xff] %v4283_v4  ;;  %v751_v28 = vrot.slane %v4033_v12, %v4109_v37  ;;  %v253_v25 = vadd.f32 %v4061_v27, %v252_v61  ;;  %v3362_v50 = vpop.f32.mrb[14].mxu0  ;;  %v826_v32 = vmul.bf16 %v3176_v2, %v4262_v10  ;;  %v5495_v34 = vrot.slane %v4237_v35, 1 }
  0xfc   :  { %5494 = vst [vmem:[#allocation45_spill] sm:$0xff] %v4289_v33  ;;  %v969_v54 = vrot.slane %v4082_v55, %v4109_v37  ;;  %v4300_v3 = vmax.f32 %v261_v11, 0.0  ;;  %v264_v12 = vadd.f32 %v3362_v50, %v4061_v27  ;;  %v255_v61 = vpop.f32.mrb[15].mxu0  ;;  %v980_v10 = vrot.slane %v4050_v21, %v4109_v37 }
  0xfd   :  { %v4295_v31 = vsel %vm846_vm1, %v838_v52, %v5495_v34  ;;  %v256_v52 = vadd.f32 %v4061_v27, %v255_v61  ;;  %1119 = vrot.lane.b32.xlu0 %v826_v32, %s3619_s4  ;;  %v4315_v55 = vpack.c.bf16 %v4275_v45, %v4208_v20  ;;  %v5499_v50 = vrot.slane %v3984_v56, %v4109_v37  ;;  %v4331_v61 = vpop.permute.xlu0 %1473  ;;  %v4341_v56 = vld [vmem:[%s5379_s5 + $0x8] sm:$0xff]  }
  0xfe   :  { %5496 = vst [vmem:[#allocation46_spill] sm:$0xff] %v4295_v31  ;;  %v4305_v2 = vpack.c.bf16 %v4295_v31, %v4269_v5  ;;  %v5500_v11 = vrot.slane %v3988_v58, %v4109_v37  ;;  %v5501_v21 = vrot.slane %v3998_v62, %v4109_v37  ;;  %v5502_v27 = vrot.slane %v3991_v60, %v4109_v37 }
  0xff   :  { %5498 = vst [vmem:[#allocation48_spill] sm:$0xff] %v4315_v55  ;;  %v4333_v34 = vmax.f32 %v253_v25, 0.0  ;;  %v4335_v20 = vmax.f32 %v264_v12, 0.0  ;;  %3537 = vset.pattern.permute.xlu1 %v5503_v63  ;;  %5504 = vst [vmem:[#allocation49_spill] sm:$0xff] %v4341_v56  ;;  %v4343_v58 = vcombine.low %v674_v17, %v685_v1  ;;  %v947_v62 = vrot.slane %v4064_v29, %v4109_v37  ;;  %v4358_v17 = vpop.permute.xlu1 %2348 }
 0x100   :  { %5497 = vst [vmem:[#allocation47_spill] sm:$0xff] %v4305_v2  ;;  %v4323_v33 = vcombine.low %v5500_v11, %v5499_v50  ;;  %v3173_v32 = vcombine.low %v5502_v27, %v5501_v21  ;;  %v958_v60 = vrot.slane %v4044_v18, %v4109_v37  ;;  %v4349_v50 = vmax.f32 %v256_v52, 0.0  ;;  %1225 = vperm.xlu1 %3537, %v3695_v7   ;;  %v4391_v27 = vld [vmem:[%s5379_s5 + $0x10] sm:$0xff]  }
 0x101   :  { %v4352_v25 = vcombine.low %v718_v8, %v729_v6  ;;  %v4354_v12 = vcombine.low %v740_v47, %v751_v28  ;;  %v844_v11 = vrot.slane %v4300_v3, 1  ;;  %v845_v21 = vrot.slane %v4335_v20, 1  ;;  %3448 = vmatprep.subr.bf16.mxu1 %v4341_v56  ;;  %1258 = vperm.xlu0 %3536, %v3741_v22   ;;  %5507 = vst [vmem:[#allocation52_spill] sm:$0xff] %v4391_v27 }
 0x102   :  { %v3184_v29 = vcombine.low %v969_v54, %v980_v10  ;;  %v4363_v18 = vpack.c.bf16 %v4300_v3, %v4349_v50  ;;  %v843_v1 = vrot.slane %v4349_v50, 1  ;;  %v823_v7 = vmul.bf16 %v3173_v32, %v4103_v36  ;;  %3454 = vmatpush3.bf16.msra.mxu1 %v4341_v56  ;;  %v4395_v56 = vpop.permute.xlu0 %1517 }
 0x103   :  { %v842_v8 = vrot.slane %v4333_v34, 1  ;;  %v4374_v47 = vpack.c.bf16 %v4079_v41, %v4335_v20  ;;  %v4378_v10 = vpack.c.bf16 %v4333_v34, %v4229_v49  ;;  %v4382_v28 = vcombine.low %v947_v62, %v958_v60  ;;  %5508 = vst [vmem:[#allocation53_spill] sm:$0xff] %v4395_v56  ;;  %v4397_v62 = vpop.permute.xlu1 %2359  ;;  %3449 = vmatprep.subr.bf16.mxu1 %v4391_v27 }
 0x104   :  { %v1099_v52 = vmul.bf16 %v3184_v29, %v4305_v2  ;;  %1113 = vrot.lane.b32.xlu1 %v823_v7, %s3619_s4  ;;  %v283_v32 = vrot.slane %v4079_v41, 7  ;;  %v284_v6 = vrot.slane %v4088_v0, 7  ;;  %v5509_v60 = vrot.slane %v4212_v24, 1 }
 0x105   :  { %5505 = vst [vmem:[#allocation50_spill] sm:$0xff] %v4374_v47  ;;  %5506 = vst [vmem:[#allocation51_spill] sm:$0xff] %v4378_v10  ;;  %v5510_v54 = vrot.slane %v4237_v35, 1  ;;  %v4409_v7 = vsel %vm846_vm1, %v844_v11, %v845_v21  ;;  %v4419_v36 = vsel %vm846_vm1, %v843_v1, %v844_v11  ;;  %v5514_v56 = vrot.slane %v4229_v49, 1  ;;  %v4441_v11 = vld [vmem:[%s5379_s5 + $0x18] sm:$0xff]  }
 0x106   :  { %5512 = vst [vmem:[#allocation55_spill] sm:$0xff] %v4409_v7  ;;  %1143 = vrot.lane.b32.xlu0 %v1099_v52, %s3620_s20  ;;  %5513 = vst [vmem:[#allocation56_spill] sm:$0xff] %v4419_v36  ;;  %v822_v22 = vmul.bf16 %v4323_v33, %v4374_v47  ;;  %v4449_v52 = vld [vmem:[%s5380_s6 + $0x8] sm:$0xf]  ;;  %v4459_v5 = vsel %vm846_vm1, %v842_v8, %v843_v1  ;;  %3455 = vmatpush3.bf16.msra.mxu1 %v4391_v27  ;;  %v298_v0 = vrot.slane %v4335_v20, 7 }
 0x107   :  { %v4405_v29 = vsel %vm846_vm1, %v5510_v54, %v5509_v60  ;;  %v4425_v60 = vpack.c.bf16 %v4409_v7, %v4419_v36  ;;  %v4435_v45 = vsel %vm846_vm1, %v5514_v56, %v842_v8  ;;  %5516 = vst [vmem:[#allocation58_spill] sm:$0xff] %v4441_v11  ;;  %v290_v54 = vrot.slane %v4190_v40, 7  ;;  %5517 = vst [vmem:[#allocation59_spill] sm:$0xff] %v4459_v5  ;;  %v4508_v7 = vld [vmem:[%s5379_s5 + $0x20] sm:$0xff]  }
 0x108   :  { %5511 = vst [vmem:[#allocation54_spill] sm:$0xff] %v4405_v29  ;;  %v4415_v2 = vpack.c.bf16 %v4283_v4, %v4405_v29  ;;  %5515 = vst [vmem:[#allocation57_spill] sm:$0xff] %v4435_v45  ;;  %1236 = vperm.xlu1 %3537, %v4449_v52   ;;  %v825_v56 = vmul.bf16 %v4343_v58, %v4178_v14  ;;  %v4468_v58 = vpop.permute.xlu1 %2569  ;;  %v4472_v31 = vpack.c.bf16 %v4459_v5, %v4435_v45  ;;  %v4483_v29 = vpop.permute.xlu0 %1539 }
 0x109   :  { %5518 = vst [vmem:[#allocation60_spill] sm:$0xff] %v4468_v58  ;;  %v5519_v8 = vrot.slane %v4079_v41, 1  ;;  %v289_v33 = vrot.slane %v4141_v30, 7  ;;  %v5521_v14 = vrot.slane %v4145_v48, 7  ;;  %v5522_v58 = vrot.slane %v4085_v9, 7  ;;  %3450 = vmatprep.subr.bf16.mxu1 %v4441_v11  ;;  %5524 = vst [vmem:[#allocation63_spill] sm:$0xff] %v4508_v7 }
 0x10a   :  { %1111 = vrot.lane.b32.xlu0 %v822_v22, %s3619_s4  ;;  %v297_v22 = vrot.slane %v4300_v3, 7  ;;  %v295_v5 = vrot.slane %v4333_v34, 7  ;;  %3456 = vmatpush3.bf16.msra.mxu1 %v4441_v11  ;;  %v828_v45 = vmul.bf16 %v4354_v12, %v4378_v10  ;;  %v5538_v12 = vrot.slane %v4145_v48, 7 }
 0x10b   :  { %v4480_v47 = vsel %vm846_vm1, %v845_v21, %v5519_v8  ;;  %v4494_v1 = vsel %vm301_vm2, %v5522_v58, %v5521_v14  ;;  %v288_v21 = vrot.slane %v4164_v42, 7  ;;  %v294_v8 = vrot.slane %v4229_v49, 7  ;;  %3451 = vmatprep.subr.bf16.mxu1 %v4508_v7 }
 0x10c   :  { %5520 = vst [vmem:[#allocation61_spill] sm:$0xff] %v4480_v47  ;;  %1117 = vrot.lane.b32.xlu1 %v825_v56, %s3619_s4  ;;  %v4503_v27 = vpack.c.bf16 %v4494_v1, %v4122_v13  ;;  %v5525_v14 = vrot.slane %v4220_v43, 7  ;;  %v4518_v36 = vsel %vm301_vm2, %v289_v33, %v290_v54  ;;  %v4522_v56 = vpack.c.bf16 %v4133_v51, %v4480_v47 }
 0x10d   :  { %5527 = vst [vmem:[#allocation65_spill] sm:$0xff] %v4518_v36  ;;  %v5532_v47 = vrot.slane %v4071_v57, 7  ;;  %v4552_v11 = vpop.permute.xlu1 %1528  ;;  %v5539_v10 = vrot.slane %v4039_v16, %v4109_v37 }
 0x10e   :  { %5523 = vst [vmem:[#allocation62_spill] sm:$0xff] %v4503_v27  ;;  %v4514_v58 = vsel %vm301_vm2, %v290_v54, %v5525_v14  ;;  %5528 = vst [vmem:[#allocation66_spill] sm:$0xff] %v4522_v56  ;;  %v4526_v27 = vsel %vm301_vm2, %v283_v32, %v284_v6  ;;  %1291 = vperm.xlu0 %3536, %v3772_v39   ;;  %v1098_v14 = vmul.bf16 %v4382_v28, %v4315_v55  ;;  %v4549_v39 = vld [vmem:[%s5379_s5 + $0x28] sm:$0xff]  }
 0x10f   :  { %5526 = vst [vmem:[#allocation64_spill] sm:$0xff] %v4514_v58  ;;  %5529 = vst [vmem:[#allocation67_spill] sm:$0xff] %v4526_v27  ;;  %v4534_v4 = vpack.c.bf16 %v4514_v58, %v4518_v36  ;;  %v4538_v54 = vsel %vm301_vm2, %v298_v0, %v283_v32  ;;  %v4544_v56 = vsel %vm301_vm2, %v284_v6, %v5532_v47  ;;  %v296_v28 = vrot.slane %v4349_v50, 7 }
 0x110   :  { %5531 = vst [vmem:[#allocation69_spill] sm:$0xff] %v4538_v54  ;;  %5533 = vst [vmem:[#allocation70_spill] sm:$0xff] %v4549_v39  ;;  %v4558_v32 = vpack.c.bf16 %v4544_v56, %v4526_v27  ;;  %v4562_v6 = vsel %vm301_vm2, %v297_v22, %v298_v0  ;;  %v1002_v47 = vrot.slane %v4056_v26, %v4109_v37  ;;  %v293_v55 = vrot.slane %v4212_v24, 7 }
 0x111   :  { %5530 = vst [vmem:[#allocation68_spill] sm:$0xff] %v4534_v4  ;;  %5535 = vst [vmem:[#allocation72_spill] sm:$0xff] %v4562_v6  ;;  %1141 = vrot.lane.b32.xlu1 %v1098_v14, %s3620_s20  ;;  %v4573_v4 = vpack.c.bf16 %v4538_v54, %v4562_v6  ;;  %v292_v0 = vrot.slane %v4237_v35, 7  ;;  %3457 = vmatpush3.bf16.msra.mxu1 %v4508_v7  ;;  %v4583_v26 = vsel %vm301_vm2, %v288_v21, %v289_v33 }
 0x112   :  { %5534 = vst [vmem:[#allocation71_spill] sm:$0xff] %v4558_v32  ;;  %v4575_v32 = vpop.permute.xlu0 %1561  ;;  %5537 = vst [vmem:[#allocation74_spill] sm:$0xff] %v4583_v26  ;;  %v4589_v14 = vsel %vm301_vm2, %v5538_v12, %v288_v21  ;;  %1123 = vrot.lane.b32.xlu0 %v828_v45, %s3619_s4  ;;  %v827_v27 = vmul.bf16 %v4352_v25, %v4256_v23  ;;  %3452 = vmatprep.subr.bf16.mxu1 %v4549_v39  ;;  %v4625_v12 = vpop.permute.xlu1 %2580 }
 0x113   :  { %5536 = vst [vmem:[#allocation73_spill] sm:$0xff] %v4573_v4  ;;  %v5540_v4 = vrot.slane %v4021_v19, %v4109_v37  ;;  %v4602_v33 = vpack.c.bf16 %v4583_v26, %v4589_v14  ;;  %v4607_v21 = vsel %vm301_vm2, %v294_v8, %v295_v5  ;;  %v4611_v16 = vsel %vm301_vm2, %v293_v55, %v294_v8 }
 0x114   :  { %5541 = vst [vmem:[#allocation75_spill] sm:$0xff] %v4607_v21  ;;  %5542 = vst [vmem:[#allocation76_spill] sm:$0xff] %v4611_v16  ;;  %v4615_v19 = vsel %vm301_vm2, %v296_v28, %v297_v22  ;;  %v4619_v45 = vsel %vm301_vm2, %v295_v5, %v296_v28  ;;  %v4630_v8 = vpack.c.bf16 %v4607_v21, %v4611_v16  ;;  %v5553_v21 = vmov 6  }
 0x115   :  { %v3179_v54 = vcombine.low %v5540_v4, %v5539_v10  ;;  %5543 = vst [vmem:[#allocation77_spill] sm:$0xff] %v4615_v19  ;;  %5544 = vst [vmem:[#allocation78_spill] sm:$0xff] %v4619_v45  ;;  %v5545_v4 = vrot.slane %v4139_v46, %v4109_v37  ;;  %1121 = vrot.lane.b32.xlu1 %v827_v27, %s3619_s4  ;;  %v4634_v22 = vpack.c.bf16 %v4615_v19, %v4619_v45  ;;  %v3558_v45 = vld [vmem:[%s5379_s5 + $0x30] sm:$0xff]  }
 0x116   :  { %5546 = vst [vmem:[#allocation79_spill] sm:$0xff] %v4630_v8  ;;  %v1035_v5 = vrot.slane %v4249_v44, %v4109_v37  ;;  %3458 = vmatpush3.bf16.msra.mxu1 %v4549_v39  ;;  %v4641_v46 = vsel %vm301_vm2, %v292_v0, %v293_v55  ;;  %v1046_v28 = vrot.slane %v4075_v15, %v4109_v37  ;;  %v5557_v39 = vld [vmem:[#allocation25_spill] sm:$0xff] }
 0x117   :  { %v3185_v25 = vcombine.low %v5545_v4, %v1002_v47  ;;  %v829_v10 = vmul.bf16 %v3179_v54, %v4363_v18  ;;  %5547 = vst [vmem:[#allocation80_spill] sm:$0xff] %v4634_v22  ;;  %5548 = vst [vmem:[#allocation81_spill] sm:$0xff] %v4641_v46  ;;  %v5549_v54 = vrot.slane %v4220_v43, 7  ;;  %v4659_v4 = vpop.permute.xlu0 %1583  ;;  %v2368_v55 = vrot.slane %v4397_v62, %v4109_v37 }
 0x118   :  { %v3187_v38 = vcombine.low %v1035_v5, %v1046_v28  ;;  %v4701_v28 = vld [vmem:[%s5380_s6 + $0x20] sm:$0xf]  ;;  %v2357_v19 = vrot.slane %v4358_v17, %v4109_v37  ;;  %v5552_v6 = vpack.c.bf16 %v4164_v42, %v4145_v48  ;;  %v1548_v62 = vrot.slane %v4483_v29, %v4109_v37  ;;  %3363 = vmatprep.subr.bf16.mxu0 %v3558_v45  ;;  %v3559_v48 = vld [vmem:[%s5379_s5 + $0x38] sm:$0xff]  }
 0x119   :  { %v4647_v27 = vsel %vm301_vm2, %v5549_v54, %v292_v0  ;;  %1125 = vrot.lane.b32.xlu0 %v829_v10, %s3619_s4  ;;  %v1100_v47 = vmul.bf16 %v3185_v25, %v4415_v2  ;;  %v4667_v10 = vpop.permute.xlu1 %2591  ;;  %v5551_v0 = vpack.c.bf16 %v4085_v9, %v4071_v57  ;;  %v4686_v25 = vld [vmem:[%s5380_s6 + $0x14] sm:$0xf]  ;;  %v5428_v57 = vmov 6   ;;  %v3572_v9 = vld [vmem:[%s5380_s6 + $0x4] sm:$0xf]  ;;  %3364 = vmatpush3.bf16.msra.mxu0 %v3558_v45 }
 0x11a   :  { %5550 = vst [vmem:[#allocation82_spill] sm:$0xff] %v4647_v27  ;;  %v4655_v44 = vpack.c.bf16 %v4641_v46, %v4647_v27  ;;  %v3253_v36 = vcombine.low %v2357_v19, %v2368_v55  ;;  %v1537_v17 = vrot.slane %v4552_v11, %v4109_v37  ;;  %v5554_v42 = vpack.c.bf16 %v4190_v40, %v4141_v30  ;;  %v3576_v11 = vld [vmem:[%s5380_s6 + $0xc] sm:$0xf]  ;;  %v5555_v19 = vld [vmem:[#allocation32_spill] sm:$0xff] }
 0x11b   :  { %1145 = vrot.lane.b32.xlu1 %v1100_v47, %s3620_s20  ;;  %v1102_v47 = vmul.bf16 %v3187_v38, %v4425_v60  ;;  %v4689_v54 = vpop.permute.xlu0 %1605  ;;  %v1024_v29 = vrot.slane %v4067_v59, %v4109_v37  ;;  %3365 = vmatprep.subr.bf16.mxu0 %v3559_v48  ;;  %v1482_v55 = vrot.slane %v4331_v61, %v4109_v37 }
 0x11c   :  { %v2550_v40 = vmul.bf16 %v3253_v36, %v5555_v19  ;;  %v3199_v30 = vcombine.low %v1537_v17, %v1548_v62  ;;  %v3560_v36 = vld [vmem:[%s5379_s5 + $0x40] sm:$0xff]   ;;  %v5559_v62 = vld [vmem:[#allocation42_spill] sm:$0xff]  ;;  %v5560_v17 = vld [vmem:[#allocation43_spill] sm:$0xff] }
 0x11d   :  { %1703 = vrot.lane.b32.xlu0 %v5551_v0, %s3619_s4  ;;  %v4691_v5 = vpop.permute.xlu1 %2381  ;;  %3366 = vmatpush3.bf16.msra.mxu0 %v3559_v48  ;;  %v5561_v19 = vpack.c.bf16 %v5559_v62, %v5560_v17  ;;  %v5562_v48 = vld [vmem:[#allocation34_spill] sm:$0xff] }
 0x11e   :  { %3367 = vmatprep.subr.bf16.mxu0 %v3560_v36 }
 0x11f   :  { %1269 = vperm.xlu1 %3537, %v4686_v25   ;;  %v4706_v0 = vpop.permute.xlu0 %1627  ;;  %v1688_v61 = vmul.bf16 %v3199_v30, %v5561_v19  ;;  %v5563_v30 = vld [vmem:[#allocation30_spill] sm:$0xff]  ;;  %v3562_v19 = vld [vmem:[%s5379_s5 + $0x50] sm:$0xff]  }
 0x121   :  { %1149 = vrot.lane.b32.xlu0 %v1102_v47, %s3620_s20  ;;  %v4704_v38 = vpop.permute.xlu1 %1550  ;;  %v4712_v47 = vld [vmem:[%s5380_s6 + $0x2c] sm:$0xf]  ;;  %3368 = vmatpush3.bf16.msra.mxu0 %v3560_v36 }
 0x123   :  { %3538 = vset.pattern.permute.xlu1 %v5428_v57  ;;  %v4725_v57 = vpop.permute.xlu0 %2326 }
 0x124   :  { %2105 = vperm.xlu1 %3538, %v3572_v9   ;;  %v4718_v9 = vld [vmem:[%s5380_s6 + $0x18] sm:$0xf] }
 0x125   :  { %1302 = vperm.xlu0 %3536, %v4701_v28   ;;  %v4721_v15 = vpop.permute.xlu1 %2392 }
 0x128   :  { %3539 = vset.pattern.permute.xlu1 %v5503_v63 }
 0x129   :  { %1335 = vperm.xlu0 %3536, %v4712_v47   ;;  %1280 = vperm.xlu1 %3539, %v4718_v9   ;;  %v4737_v26 = vpop.permute.xlu1 %2403 }
 0x12d   :  { %1705 = vrot.lane.b32.xlu0 %v5552_v6, %s3619_s4  ;;  %3540 = vset.pattern.permute.xlu1 %v5553_v21  ;;  %v4755_v6 = vpop.permute.xlu0 %2370 }
 0x12e   :  { %2116 = vperm.xlu1 %3540, %v4449_v52   ;;  %v1013_v52 = vrot.slane %v4188_v53, %v4109_v37  ;;  %v4761_v45 = vpop.permute.xlu1 %2613  ;;  %v5556_v53 = vld [vmem:[#allocation26_spill] sm:$0xff] }
 0x130   :  { %v3186_v59 = vcombine.low %v1013_v52, %v1024_v29 }
 0x131   :  { %1707 = vrot.lane.b32.xlu0 %v5554_v42, %s3619_s4  ;;  %v1471_v42 = vrot.slane %v5556_v53, %v4109_v37  ;;  %v4781_v52 = vpop.permute.xlu0 %2414 }
 0x132   :  { %2127 = vperm.xlu1 %3540, %v3576_v11   ;;  %v5558_v11 = vpack.c.bf16 %v5557_v39, %v4079_v41  ;;  %v1101_v41 = vmul.bf16 %v3186_v59, %v4472_v31  ;;  %v3561_v39 = vld [vmem:[%s5379_s5 + $0x48] sm:$0xff]   ;;  %v4799_v59 = vld [vmem:[%s5380_s6 + $0x30] sm:$0xf] }
 0x133   :  { %v3196_v53 = vcombine.low %v1471_v42, %v1482_v55  ;;  %v4783_v29 = vpop.permute.xlu1 %1572  ;;  %v1493_v55 = vrot.slane %v5563_v30, %v4109_v37  ;;  %3369 = vmatprep.subr.bf16.mxu0 %v3561_v39  ;;  %v5564_v42 = vld [vmem:[#allocation29_spill] sm:$0xff]  ;;  %v3563_v30 = vld [vmem:[%s5379_s5 + $0x58] sm:$0xff]  }
 0x134   :  { %3370 = vmatpush3.bf16.msra.mxu0 %v3561_v39  ;;  %v1581_v46 = vrot.slane %v4783_v29, %v4109_v37  ;;  %v5573_v29 = vld [vmem:[#allocation53_spill] sm:$0xff] }
 0x135   :  { %2799 = vrot.lane.b32.xlu0 %v2550_v40, %s3619_s4  ;;  %v1504_v40 = vrot.slane %v5562_v48, %v4109_v37  ;;  %3371 = vmatprep.subr.bf16.mxu0 %v3562_v19 }
 0x136   :  { %1701 = vrot.lane.b32.xlu1 %v5558_v11, %s3619_s4  ;;  %v5565_v11 = vpack.c.bf16 %v5564_v42, %v4133_v51  ;;  %v5566_v51 = vld [vmem:[#allocation35_spill] sm:$0xff]  ;;  %v3579_v42 = vld [vmem:[%s5380_s6] sm:$0xf] }
 0x137   :  { %3541 = vset.pattern.permute.xlu1 %v5503_v63  ;;  %v3197_v17 = vcombine.low %v1493_v55, %v1504_v40 }
 0x138   :  { %v1685_v62 = vmul.bf16 %v3196_v53, %v5565_v11  ;;  %v4802_v36 = vpop.permute.xlu1 %2624  ;;  %v5567_v53 = vld [vmem:[#allocation28_spill] sm:$0xff]  ;;  %3372 = vmatpush3.bf16.msra.mxu0 %v3562_v19 }
 0x139   :  { %1731 = vrot.lane.b32.xlu0 %v1688_v61, %s3620_s20  ;;  %v4807_v61 = vpop.permute.xlu0 %2458  ;;  %v5568_v48 = vpack.c.bf16 %v5566_v51, %v5567_v53  ;;  %3373 = vmatprep.subr.bf16.mxu0 %v3563_v30  ;;  %v3581_v51 = vld [vmem:[%s5380_s6 + $0x10] sm:$0xf] }
 0x13a   :  { %1147 = vrot.lane.b32.xlu1 %v1101_v41, %s3620_s20  ;;  %v4816_v41 = vld [vmem:[%s5380_s6 + $0x3c] sm:$0xf] }
 0x13b   :  { %v1686_v40 = vmul.bf16 %v3197_v17, %v5568_v48  ;;  %v5569_v17 = vld [vmem:[#allocation40_spill] sm:$0xff] }
 0x13c   :  { %v4819_v39 = vpop.permute.xlu1 %2635  ;;  %3374 = vmatpush3.bf16.msra.mxu0 %v3563_v30 }
 0x13d   :  { %1346 = vperm.xlu0 %3536, %v4799_v59   ;;  %v4825_v55 = vpop.permute.xlu0 %2491  ;;  %3391 = vmatprep.subr.bf16.mxu0 %v5569_v17 }
 0x13e   :  { %1725 = vrot.lane.b32.xlu1 %v1685_v62, %s3620_s20  ;;  %v4836_v62 = vld [vmem:[%s5380_s6 + $0x24] sm:$0xf] }
 0x141   :  { %1379 = vperm.xlu0 %3536, %v4816_v41   ;;  %v4831_v11 = vpop.permute.xlu1 %2425  ;;  %v2559_v19 = vpop.permute.xlu0 %2558 }
 0x142   :  { %1727 = vrot.lane.b32.xlu1 %v1686_v40, %s3620_s20  ;;  %v2412_v40 = vrot.slane %v4737_v26, %v4109_v37  ;;  %v2335_v26 = vrot.slane %v4725_v57, %v4109_v37  ;;  %v4888_v57 = vld [vmem:[%s5379_s5 + $0x60] sm:$0xff]  }
 0x143   :  { %3419 = vmatprep.subr.bf16.mxu1 %v4888_v57 }
 0x145   :  { %3548 = vset.pattern.permute.xlu0 %v5553_v21  ;;  %v4847_v48 = vpop.permute.xlu0 %2602 }
 0x146   :  { %2094 = vperm.xlu0 %3548, %v3579_v42   ;;  %1313 = vperm.xlu1 %3541, %v4836_v62   ;;  %v4844_v53 = vpop.permute.xlu1 %1594  ;;  %v4858_v42 = vld [vmem:[%s5380_s6 + $0x28] sm:$0xf] }
 0x149   :  { %v4867_v17 = vpop.permute.xlu0 %2646 }
 0x14a   :  { %2138 = vperm.xlu0 %3548, %v3581_v51   ;;  %3542 = vset.pattern.permute.xlu1 %v5553_v21 }
 0x14b   :  { %2149 = vperm.xlu1 %3542, %v4686_v25   ;;  %v4853_v30 = vpop.permute.xlu1 %2436  ;;  %v2401_v25 = vrot.slane %v4721_v15, %v4109_v37  ;;  %v5571_v15 = vld [vmem:[#allocation39_spill] sm:$0xff] }
 0x14c   :  { %v2346_v7 = vrot.slane %v5571_v15, %v4109_v37  ;;  %v5575_v15 = vld [vmem:[#allocation41_spill] sm:$0xff] }
 0x14d   :  { %v3255_v51 = vcombine.low %v2401_v25, %v2412_v40  ;;  %v1526_v40 = vrot.slane %v5573_v29, %v4109_v37  ;;  %v5574_v25 = vld [vmem:[#allocation45_spill] sm:$0xff]  ;;  %v4895_v27 = vpop.permute.xlu0 %2701  ;;  %v5576_v29 = vld [vmem:[#allocation27_spill] sm:$0xff] }
 0x14e   :  { %2182 = vperm.xlu0 %3548, %v4701_v28   ;;  %v5570_v28 = vpack.c.bf16 %v4237_v35, %v4220_v43  ;;  %v1592_v43 = vrot.slane %v4659_v4, %v4109_v37  ;;  %v5572_v35 = vpack.c.bf16 %v4229_v49, %v4212_v24  ;;  %v3583_v49 = vld [vmem:[%s5380_s6 + $0x1c] sm:$0xf] }
 0x14f   :  { %3543 = vset.pattern.permute.xlu1 %v5503_v63  ;;  %v4873_v16 = vpop.permute.xlu1 %2447  ;;  %v2552_v58 = vmul.bf16 %v3255_v51, %v5575_v15  ;;  %v5578_v51 = vld [vmem:[#allocation44_spill] sm:$0xff] }
 0x150   :  { %1324 = vperm.xlu1 %3543, %v4858_v42   ;;  %v3201_v4 = vcombine.low %v1581_v46, %v1592_v43 }
 0x152   :  { %1709 = vrot.lane.b32.xlu0 %v5570_v28, %s3619_s4  ;;  %v1515_v28 = vrot.slane %v5574_v25, %v4109_v37  ;;  %v5580_v25 = vld [vmem:[#allocation60_spill] sm:$0xff] }
 0x153   :  { %v2578_v15 = vrot.slane %v5580_v25, %v4109_v37 }
 0x154   :  { %3544 = vset.pattern.permute.xlu1 %v5553_v21  ;;  %v2658_v24 = vpop.permute.xlu1 %2657 }
 0x155   :  { %2160 = vperm.xlu1 %3544, %v4718_v9   ;;  %v3252_v9 = vcombine.low %v2335_v26, %v2346_v7  ;;  %v2567_v7 = vrot.slane %v2559_v19, %v4109_v37  ;;  %v5577_v26 = vld [vmem:[#allocation57_spill] sm:$0xff] }
 0x156   :  { %1711 = vrot.lane.b32.xlu0 %v5572_v35, %s3619_s4  ;;  %v3198_v35 = vcombine.low %v1515_v28, %v1526_v40  ;;  %v5579_v46 = vpack.c.bf16 %v5577_v26, %v5578_v51  ;;  %v5582_v40 = vld [vmem:[#allocation36_spill] sm:$0xff]  ;;  %v2589_v26 = vrot.slane %v4625_v12, %v4109_v37  ;;  %v5584_v51 = vld [vmem:[#allocation31_spill] sm:$0xff]  ;;  %v5585_v12 = vld [vmem:[#allocation9_spill] sm:$0xff] }
 0x157   :  { %v2549_v22 = vmul.bf16 %v3252_v9, %v5576_v29  ;;  %v3260_v9 = vcombine.low %v2567_v7, %v2578_v15  ;;  %v2423_v29 = vrot.slane %v4781_v52, %v4109_v37  ;;  %v1614_v52 = vrot.slane %v4689_v54, %v4109_v37 }
 0x158   :  { %v1690_v43 = vmul.bf16 %v3201_v4, %v5579_v46  ;;  %v2600_v4 = vrot.slane %v4667_v10, %v4109_v37  ;;  %v1603_v10 = vrot.slane %v4844_v53, %v4109_v37 }
 0x159   :  { %2171 = vperm.xlu1 %3544, %v3583_v49   ;;  %v4911_v8 = vpop.permute.xlu1 %1616  ;;  %v4913_v49 = vpop.permute.xlu0 %1214  ;;  %v2781_v46 = vmul.bf16 %v3260_v9, %v5584_v51  ;;  %v2655_v9 = vrot.slane %v4867_v17, %v4109_v37  ;;  %v5592_v17 = vld [vmem:[#allocation62_spill] sm:$0xff] }
 0x15a   :  { %2803 = vrot.lane.b32.xlu0 %v2552_v58, %s3619_s4  ;;  %v5581_v58 = vld [vmem:[#allocation37_spill] sm:$0xff] }
 0x15b   :  { %v5583_v19 = vpack.c.bf16 %v5581_v58, %v5582_v40  ;;  %v5587_v58 = vld [vmem:[#allocation38_spill] sm:$0xff] }
 0x15d   :  { %2797 = vrot.lane.b32.xlu1 %v2549_v22, %s3619_s4  ;;  %v1687_v28 = vmul.bf16 %v3198_v35, %v5583_v19  ;;  %v2434_v22 = vrot.slane %v4831_v11, %v4109_v37  ;;  %v3261_v35 = vcombine.low %v2589_v26, %v2600_v4  ;;  %v4932_v25 = vpop.permute.xlu0 %1247  ;;  %v5586_v11 = vld [vmem:[#allocation10_spill] sm:$0xff]  ;;  %v2666_v4 = vrot.slane %v2658_v24, %v4109_v37  ;;  %v5590_v26 = vld [vmem:[#allocation59_spill] sm:$0xff] }
 0x15e   :  { %1735 = vrot.lane.b32.xlu0 %v1690_v43, %s3620_s20  ;;  %3545 = vset.pattern.permute.xlu1 %v5503_v63  ;;  %v2669_v7 = vpop.permute.xlu1 %2668  ;;  %v401_v15 = vrot.slane %v5586_v11, %v4109_v37 }
 0x15f   :  { %v3256_v43 = vcombine.low %v2423_v29, %v2434_v22  ;;  %v2782_v40 = vmul.bf16 %v3261_v35, %v5587_v58  ;;  %v5588_v29 = vmov 8   ;;  %v5589_v22 = vld [vmem:[#allocation56_spill] sm:$0xff] }
 0x161   :  { %1729 = vrot.lane.b32.xlu1 %v1687_v28, %s3620_s20  ;;  %v2553_v53 = vmul.bf16 %v3256_v43, %v4256_v23  ;;  %v3202_v28 = vcombine.low %v1603_v10, %v1614_v52  ;;  %v4960_v10 = vld [vmem:[%s5380_s6 + $0x34] sm:$0xf]  ;;  %v2677_v52 = vrot.slane %v2669_v7, %v4109_v37 }
 0x162   :  { %2226 = vperm.xlu0 %3548, %v4799_v59   ;;  %v413_v59 = vrot.slane %v5585_v12, %v4109_v37  ;;  %v2680_v19 = vpop.permute.xlu1 %2679  ;;  %v3264_v12 = vcombine.low %v2655_v9, %v2666_v4 }
 0x163   :  { %v2688_v23 = vrot.slane %v2680_v19, %v4109_v37 }
 0x165   :  { %2821 = vrot.lane.b32.xlu1 %v2781_v46, %s3620_s20  ;;  %v1116_v54 = vpop.permute.xlu0 %1115  ;;  %v5591_v46 = vpack.c.bf16 %v5589_v22, %v5590_v26  ;;  %v3265_v58 = vcombine.low %v2677_v52, %v2688_v23  ;;  %v4987_v22 = vld [vmem:[%s5380_s6 + $0x38] sm:$0xf]  ;;  %v1559_v52 = vrot.slane %v4704_v38, %v4109_v37  ;;  %v2622_v38 = vrot.slane %v4761_v45, %v4109_v37  ;;  %v5600_v45 = vld [vmem:[#allocation46_spill] sm:$0xff] }
 0x166   :  { %2259 = vperm.xlu0 %3548, %v4816_v41   ;;  %v3166_v41 = vcombine.low %v401_v15, %v413_v59  ;;  %v2785_v15 = vmul.bf16 %v3264_v12, %v4415_v2 }
 0x167   :  { %v1691_v35 = vmul.bf16 %v3202_v28, %v5591_v46  ;;  %v4954_v43 = vpop.permute.xlu1 %2469  ;;  %v5594_v28 = vld [vmem:[#allocation24_spill] sm:$0xff]  ;;  %v2786_v2 = vmul.bf16 %v3265_v58, %v4472_v31  ;;  %v5595_v31 = vld [vmem:[#allocation66_spill] sm:$0xff] }
 0x168   :  { %v584_v24 = vmul.bf16 %v3166_v41, %v5592_v17  ;;  %v892_v9 = vrot.slane %v5594_v28, %v4109_v37  ;;  %v2710_v41 = vrot.slane %v4895_v27, %v4109_v37  ;;  %v2379_v27 = vrot.slane %v4755_v6, %v4109_v37 }
 0x169   :  { %2823 = vrot.lane.b32.xlu1 %v2782_v40, %s3620_s20 }
 0x16a   :  { %2805 = vrot.lane.b32.xlu0 %v2553_v53, %s3619_s4  ;;  %v1160_v59 = vsel %vm1151_vm3, %v584_v24, %v1116_v54  ;;  %v1140_v11 = vpop.permute.xlu0 %1139  ;;  %v5593_v53 = vld [vmem:[#allocation21_spill] sm:$0xff] }
 0x16b   :  { %3550 = vset.pattern.permute.xlu0 %v5588_v29  ;;  %v1182_v40 = vsel %vm1176_vm4, %v1160_v59, %v1140_v11  ;;  %v4968_v19 = vpop.permute.xlu1 %2480  ;;  %v881_v7 = vrot.slane %v5593_v53, %v4109_v37 }
 0x16c   :  { %3407 = vmatprep.mubr.msk.bf16.mxu1 %vm1830_vm5, %v1182_v40 }
 0x16d   :  { %1357 = vperm.xlu1 %3545, %v4960_v10   ;;  %v3180_v54 = vcombine.low %v881_v7, %v892_v9 }
 0x16e   :  { %1737 = vrot.lane.b32.xlu0 %v1691_v35, %s3620_s20  ;;  %v2390_v35 = vrot.slane %v4691_v5, %v4109_v37 }
 0x16f   :  { %v1095_v26 = vmul.bf16 %v3180_v54, %v5595_v31  ;;  %v1120_v5 = vpop.permute.xlu0 %1119 }
 0x170   :  { %v3254_v24 = vcombine.low %v2379_v27, %v2390_v35  ;;  %v2633_v35 = vrot.slane %v4802_v36, %v4109_v37 }
 0x171   :  { %3546 = vset.pattern.permute.xlu1 %v5553_v21  ;;  %v2691_v4 = vpop.permute.xlu1 %2690 }
 0x172   :  { %2829 = vrot.lane.b32.xlu0 %v2785_v15, %s3620_s20  ;;  %2193 = vperm.xlu1 %3546, %v4836_v62   ;;  %v2699_v29 = vrot.slane %v2691_v4, %v4109_v37 }
 0x174   :  { %v3266_v62 = vcombine.low %v2699_v29, %v2710_v41  ;;  %v2644_v29 = vrot.slane %v4819_v39, %v4109_v37 }
 0x175   :  { %v2713_v46 = vpop.permute.xlu1 %2712 }
 0x176   :  { %2831 = vrot.lane.b32.xlu0 %v2786_v2, %s3620_s20  ;;  %3547 = vset.pattern.permute.xlu1 %v5503_v63  ;;  %v2787_v12 = vmul.bf16 %v3266_v62, %v4425_v60  ;;  %v1570_v63 = vrot.slane %v4575_v32, %v4109_v37  ;;  %v2721_v6 = vrot.slane %v2713_v46, %v4109_v37  ;;  %v5599_v2 = vld [vmem:[#allocation54_spill] sm:$0xff] }
 0x177   :  { %1368 = vperm.xlu1 %3547, %v4987_v22   ;;  %v1223_v32 = vrot.slane %v4913_v49, %v4109_v37  ;;  %v5598_v49 = vld [vmem:[#allocation8_spill] sm:$0xff]  ;;  %v5601_v4 = vpack.c.bf16 %v5599_v2, %v5600_v45  ;;  %v5612_v45 = vpack.c.bf16 %v4122_v13, %v4544_v56  ;;  %v3565_v13 = vld [vmem:[%s5379_s5 + $0x68] sm:$0xff]  }
 0x178   :  { %v3200_v15 = vcombine.low %v1559_v52, %v1570_v63  ;;  %v365_v28 = vrot.slane %v5598_v49, %v4109_v37  ;;  %v5606_v52 = vld [vmem:[#allocation12_spill] sm:$0xff]  ;;  %v5611_v49 = vld [vmem:[#allocation47_spill] sm:$0xff] }
 0x179   :  { %v2724_v23 = vpop.permute.xlu1 %2723 }
 0x17a   :  { %1135 = vrot.lane.b32.xlu0 %v1095_v26, %s3620_s20  ;;  %v2732_v60 = vrot.slane %v2724_v23, %v4109_v37  ;;  %v1689_v54 = vmul.bf16 %v3200_v15, %v5601_v4  ;;  %v5603_v26 = vld [vmem:[#allocation69_spill] sm:$0xff]  ;;  %v1256_v23 = vrot.slane %v4932_v25, %v4109_v37 }
 0x17b   :  { %3549 = vset.pattern.permute.xlu1 %v5553_v21  ;;  %v2611_v21 = vrot.slane %v4847_v48, %v4109_v37 }
 0x17c   :  { %2204 = vperm.xlu1 %3549, %v4858_v42   ;;  %v3267_v59 = vcombine.low %v2721_v6, %v2732_v60  ;;  %v5596_v42 = vld [vmem:[#allocation33_spill] sm:$0xff]  ;;  %v425_v6 = vrot.slane %v5606_v52, %v4109_v37  ;;  %v5607_v60 = vld [vmem:[#allocation48_spill] sm:$0xff] }
 0x17d   :  { %v2551_v11 = vmul.bf16 %v3254_v24, %v5596_v42  ;;  %v3262_v41 = vcombine.low %v2611_v21, %v2622_v38  ;;  %v5605_v24 = vld [vmem:[#allocation11_spill] sm:$0xff]  ;;  %v3263_v21 = vcombine.low %v2633_v35, %v2644_v29  ;;  %v5608_v42 = vld [vmem:[#allocation13_spill] sm:$0xff]  ;;  %v5613_v29 = vld [vmem:[#allocation68_spill] sm:$0xff] }
 0x17e   :  { %2833 = vrot.lane.b32.xlu0 %v2787_v12, %s3620_s20  ;;  %v2788_v58 = vmul.bf16 %v3267_v59, %v5595_v31  ;;  %v5602_v31 = vld [vmem:[#allocation67_spill] sm:$0xff]  ;;  %v437_v39 = vrot.slane %v5605_v24, %v4109_v37  ;;  %v461_v36 = vrot.slane %v5608_v42, %v4109_v37  ;;  %v5610_v38 = vld [vmem:[#allocation73_spill] sm:$0xff]  ;;  %v5615_v35 = vld [vmem:[#allocation16_spill] sm:$0xff] }
 0x17f   :  { %v1226_v40 = vpop.permute.xlu1 %1225  ;;  %v5604_v46 = vpack.c.bf16 %v5602_v31, %v5603_v26  ;;  %v2783_v59 = vmul.bf16 %v3262_v41, %v5607_v60  ;;  %v5614_v26 = vld [vmem:[#allocation15_spill] sm:$0xff]  ;;  %v3567_v42 = vld [vmem:[%s5379_s5 + $0x78] sm:$0xff]  }
 0x180   :  { %2215 = vperm.xlu1 %3549, %v4712_v47   ;;  %v1234_v53 = vrot.slane %v1226_v40, %v4109_v37  ;;  %v5016_v7 = vpop.permute.xlu0 %1258  ;;  %v5597_v47 = vld [vmem:[#allocation6_spill] sm:$0xff] }
 0x181   :  { %v353_v48 = vrot.slane %v5597_v47, %v4109_v37 }
 0x182   :  { %2835 = vrot.lane.b32.xlu0 %v2788_v58, %s3620_s20  ;;  %v3188_v9 = vcombine.low %v1223_v32, %v1234_v53 }
 0x183   :  { %v5029_v62 = vpop.permute.xlu1 %1113  ;;  %v3164_v63 = vcombine.low %v353_v48, %v365_v28  ;;  %v3167_v48 = vcombine.low %v425_v6, %v437_v39  ;;  %v2784_v28 = vmul.bf16 %v3263_v21, %v5611_v49 }
 0x184   :  { %2801 = vrot.lane.b32.xlu1 %v2551_v11, %s3619_s4  ;;  %v5034_v27 = vmul.bf16 %v3188_v9, %v5604_v46  ;;  %v1144_v12 = vpop.permute.xlu0 %1143  ;;  %v5609_v11 = vld [vmem:[#allocation14_spill] sm:$0xff]  ;;  %v485_v46 = vrot.slane %v5614_v26, %v4109_v37 }
 0x185   :  { %v449_v15 = vrot.slane %v5609_v11, %v4109_v37  ;;  %v582_v58 = vmul.bf16 %v3164_v63, %v5610_v38  ;;  %v585_v41 = vmul.bf16 %v3167_v48, %v4602_v33  ;;  %v473_v63 = vrot.slane %v5615_v35, %v4109_v37 }
 0x186   :  { %v2445_v11 = vrot.slane %v4853_v30, %v4109_v37  ;;  %v3568_v30 = vld [vmem:[%s5379_s5 + $0x80] sm:$0xff]  }
 0x187   :  { %v1237_v32 = vpop.permute.xlu1 %1236  ;;  %v3168_v2 = vcombine.low %v449_v15, %v461_v36  ;;  %v3169_v60 = vcombine.low %v473_v63, %v485_v46  ;;  %v2489_v63 = vrot.slane %v4968_v19, %v4109_v37 }
 0x188   :  { %1733 = vrot.lane.b32.xlu1 %v1689_v54, %s3620_s20  ;;  %v1245_v25 = vrot.slane %v1237_v32, %v4109_v37  ;;  %v1112_v40 = vpop.permute.xlu0 %1111 }
 0x189   :  { %v5054_v53 = vsel %vm1151_vm3, %v582_v58, %v1112_v40  ;;  %v586_v31 = vmul.bf16 %v3168_v2, %v5613_v29  ;;  %v3569_v2 = vld [vmem:[%s5379_s5 + $0x88] sm:$0xff]  }
 0x18a   :  { %v3189_v47 = vcombine.low %v1245_v25, %v1256_v23  ;;  %v1625_v25 = vrot.slane %v4911_v8, %v4109_v37  ;;  %v5618_v8 = vld [vmem:[#allocation51_spill] sm:$0xff] }
 0x18b   :  { %v1118_v9 = vpop.permute.xlu1 %1117  ;;  %v1166_v56 = vsel %vm1151_vm3, %v586_v31, %v1120_v5  ;;  %v3566_v5 = vld [vmem:[%s5379_s5 + $0x70] sm:$0xff]  }
 0x18c   :  { %2825 = vrot.lane.b32.xlu1 %v2783_v59, %s3620_s20  ;;  %v5060_v4 = vmul.bf16 %v3189_v47, %v5612_v45  ;;  %v1163_v23 = vsel %vm1151_vm3, %v585_v41, %v1118_v9  ;;  %v1186_v52 = vsel %vm1176_vm4, %v1166_v56, %v1144_v12  ;;  %v587_v12 = vmul.bf16 %v3169_v60, %v4655_v44  ;;  %v5621_v31 = vld [vmem:[#allocation55_spill] sm:$0xff]  ;;  %v5625_v60 = vld [vmem:[#allocation50_spill] sm:$0xff] }
 0x18d   :  { %v5062_v54 = vpop.permute.xlu0 %1291  ;;  %v2478_v9 = vrot.slane %v4954_v43, %v4109_v37  ;;  %v5620_v43 = vld [vmem:[#allocation61_spill] sm:$0xff] }
 0x18e   :  { %v5622_v26 = vpack.c.bf16 %v5620_v43, %v5621_v31 }
 0x18f   :  { %v1142_v24 = vpop.permute.xlu1 %1141 }
 0x190   :  { %2827 = vrot.lane.b32.xlu1 %v2784_v28, %s3620_s20  ;;  %v1184_v39 = vsel %vm1176_vm4, %v1163_v23, %v1142_v24 }
 0x191   :  { %v5078_v6 = vpop.permute.xlu0 %1123  ;;  %3408 = vmatmul.mubr.msk.bf16.vlgmr.msra.gmra.mrb[0].mxu1 %vm1830_vm5, %v1184_v39 }
 0x192   :  { %3411 = vmatprep.mubr.msk.bf16.mxu1 %vm1830_vm5, %v1186_v52  ;;  %3420 = vmatpush3.bf16.msra.mxu1 %v4888_v57 }
 0x193   :  { %v1122_v59 = vpop.permute.xlu1 %1121  ;;  %3421 = vmatprep.subr.bf16.mxu1 %v3565_v13 }
 0x194   :  { %2237 = vperm.xlu1 %3549, %v4960_v10   ;;  %v2456_v10 = vrot.slane %v4873_v16, %v4109_v37  ;;  %v1169_v32 = vsel %vm1151_vm3, %v587_v12, %v1122_v59  ;;  %v5616_v16 = vpack.c.bf16 %v4349_v50, %v4333_v34  ;;  %v1636_v34 = vrot.slane %v4706_v0, %v4109_v37 }
 0x195   :  { %v5087_v21 = vpop.permute.xlu0 %1125  ;;  %v5619_v0 = vpack.c.bf16 %v4589_v14, %v4494_v1  ;;  %v2500_v1 = vrot.slane %v4825_v55, %v4109_v37  ;;  %v5624_v55 = vld [vmem:[#allocation22_spill] sm:$0xff] }
 0x196   :  { %3422 = vmatpush3.bf16.msra.mxu1 %v3565_v13  ;;  %v3257_v58 = vcombine.low %v2445_v11, %v2456_v10  ;;  %v3203_v28 = vcombine.low %v1625_v25, %v1636_v34  ;;  %v5623_v13 = vld [vmem:[#allocation23_spill] sm:$0xff]  ;;  %v903_v52 = vrot.slane %v5624_v55, %v4109_v37 }
 0x197   :  { %v1146_v57 = vpop.permute.xlu1 %1145  ;;  %3423 = vmatprep.subr.bf16.mxu1 %v3566_v5  ;;  %v3259_v24 = vcombine.low %v2489_v63, %v2500_v1  ;;  %v914_v56 = vrot.slane %v5623_v13, %v4109_v37  ;;  %v5630_v34 = vld [vmem:[#allocation79_spill] sm:$0xff]  ;;  %v5635_v13 = vld [vmem:[#allocation64_spill] sm:$0xff] }
 0x198   :  { %2248 = vperm.xlu1 %3549, %v4987_v22   ;;  %v1188_v36 = vsel %vm1176_vm4, %v1169_v32, %v1146_v57  ;;  %v1267_v22 = vrot.slane %v5016_v7, %v4109_v37  ;;  %v5617_v7 = vpack.c.bf16 %v4335_v20, %v4300_v3  ;;  %v2554_v49 = vmul.bf16 %v3257_v58, %v5618_v8  ;;  %v5627_v32 = vld [vmem:[#allocation18_spill] sm:$0xff] }
 0x199   :  { %v5100_v15 = vpop.permute.xlu0 %1703  ;;  %3412 = vmatmul.mubr.msk.bf16.gmra.mrb[4].mxu1 %vm1830_vm5, %v1188_v36  ;;  %v2467_v3 = vrot.slane %v4807_v61, %v4109_v37  ;;  %v1692_v46 = vmul.bf16 %v3203_v28, %v5622_v26  ;;  %v2556_v59 = vmul.bf16 %v3259_v24, %v5625_v60  ;;  %v497_v57 = vrot.slane %v5627_v32, %v4109_v37  ;;  %v5628_v36 = vld [vmem:[#allocation19_spill] sm:$0xff]  ;;  %v5634_v24 = vld [vmem:[#allocation82_spill] sm:$0xff] }
 0x19a   :  { %3424 = vmatpush3.bf16.msra.mxu1 %v3566_v5  ;;  %v3181_v5 = vcombine.low %v903_v52, %v914_v56  ;;  %v533_v11 = vrot.slane %v5628_v36, %v4109_v37  ;;  %v5636_v56 = vpack.c.bf16 %v5634_v24, %v5635_v13  ;;  %v5637_v60 = vld [vmem:[#allocation58_spill] sm:$0xff]  ;;  %v5639_v36 = vld [vmem:[#allocation76_spill] sm:$0xff] }
 0x19b   :  { %3425 = vmatprep.subr.bf16.mxu1 %v3567_v42  ;;  %v3258_v35 = vcombine.low %v2467_v3, %v2478_v9 }
 0x19c   :  { %1713 = vrot.lane.b32.xlu1 %v5616_v16, %s3619_s4  ;;  %v5629_v16 = vld [vmem:[#allocation20_spill] sm:$0xff]  ;;  %v1096_v58 = vmul.bf16 %v3181_v5, %v5584_v51 }
 0x19d   :  { %v1150_v50 = vpop.permute.xlu0 %1149  ;;  %v2555_v61 = vmul.bf16 %v3258_v35, %v4363_v18  ;;  %v5626_v18 = vld [vmem:[#allocation17_spill] sm:$0xff] }
 0x19e   :  { %v1270_v40 = vpop.permute.xlu1 %1269  ;;  %3426 = vmatpush3.bf16.msra.mxu1 %v3567_v42  ;;  %v509_v10 = vrot.slane %v5626_v18, %v4109_v37  ;;  %v5632_v35 = vld [vmem:[#allocation49_spill] sm:$0xff] }
 0x19f   :  { %v1278_v47 = vrot.slane %v1270_v40, %v4109_v37  ;;  %3427 = vmatprep.subr.bf16.mxu1 %v3568_v30 }
 0x1a0   :  { %1715 = vrot.lane.b32.xlu1 %v5617_v7, %s3619_s4  ;;  %v3170_v25 = vcombine.low %v497_v57, %v509_v10  ;;  %v5638_v10 = vld [vmem:[#allocation63_spill] sm:$0xff] }
 0x1a1   :  { %v3190_v48 = vcombine.low %v1267_v22, %v1278_v47  ;;  %v521_v22 = vrot.slane %v5629_v16, %v4109_v37 }
 0x1a2   :  { %3428 = vmatpush3.bf16.msra.mxu1 %v3568_v30  ;;  %v588_v7 = vmul.bf16 %v3170_v25, %v5630_v34 }
 0x1a3   :  { %v5130_v45 = vmul.bf16 %v3190_v48, %v5619_v0  ;;  %v5132_v20 = vpop.permute.xlu1 %2105  ;;  %3429 = vmatprep.subr.bf16.mxu1 %v3569_v2  ;;  %v3171_v30 = vcombine.low %v521_v22, %v533_v11  ;;  %v5631_v48 = vld [vmem:[#allocation80_spill] sm:$0xff]  ;;  %v5640_v11 = vld [vmem:[#allocation81_spill] sm:$0xff] }
 0x1a4   :  { %v1303_v41 = vpop.permute.xlu0 %1302  ;;  %2807 = vrot.lane.b32.xlu1 %v2554_v49, %s3619_s4  ;;  %v1172_v49 = vsel %vm1151_vm3, %v588_v7, %v5078_v6  ;;  %v1746_v6 = vsel %vm1151_vm3, %v5060_v4, %v5100_v15  ;;  %v5641_v16 = vpack.c.bf16 %v5639_v36, %v5640_v11 }
 0x1a5   :  { %v589_v8 = vmul.bf16 %v3171_v30, %v5631_v48  ;;  %v1311_v63 = vrot.slane %v1303_v41, %v4109_v37 }
 0x1a6   :  { %3430 = vmatpush3.bf16.msra.mxu1 %v3569_v2 }
 0x1a7   :  { %v1175_v9 = vsel %vm1151_vm3, %v589_v8, %v5087_v21 }
 0x1a8   :  { %v5144_v14 = vpop.permute.xlu0 %1335  ;;  %v5146_v23 = vpop.permute.xlu1 %1280  ;;  %1739 = vrot.lane.b32.xlu1 %v1692_v46, %s3620_s20  ;;  %v1192_v2 = vsel %vm1176_vm4, %v1175_v9, %v1150_v50 }
 0x1a9   :  { %v1344_v5 = vrot.slane %v5144_v14, %v4109_v37  ;;  %v1300_v14 = vrot.slane %v5062_v54, %v4109_v37  ;;  %v1289_v25 = vrot.slane %v5146_v23, %v4109_v37  ;;  %v5643_v54 = vld [vmem:[#allocation65_spill] sm:$0xff] }
 0x1ab   :  { %v3191_v7 = vcombine.low %v1289_v25, %v1300_v14  ;;  %v5650_v25 = vld [vmem:[#allocation72_spill] sm:$0xff] }
 0x1ac   :  { %v5152_v39 = vpop.permute.xlu0 %1705  ;;  %2809 = vrot.lane.b32.xlu1 %v2555_v61, %s3619_s4  ;;  %v5633_v61 = vld [vmem:[#allocation52_spill] sm:$0xff] }
 0x1ad   :  { %v5155_v19 = vpop.permute.xlu1 %2116 }
 0x1b0   :  { %v5160_v12 = vpop.permute.xlu0 %1707  ;;  %2811 = vrot.lane.b32.xlu1 %v2556_v59, %s3619_s4 }
 0x1b1   :  { %v5167_v42 = vpop.permute.xlu1 %2127 }
 0x1b2   :  { %v2136_v9 = vrot.slane %v5167_v42, %v4109_v37 }
 0x1b4   :  { %1137 = vrot.lane.b32.xlu1 %v1096_v58, %s3620_s20  ;;  %v5175_v47 = vpop.permute.xlu0 %2799 }
 0x1b5   :  { %v1702_v40 = vpop.permute.xlu1 %1701 }
 0x1b6   :  { %v1743_v3 = vsel %vm1151_vm3, %v5034_v27, %v1702_v40  ;;  %v3586_v27 = vld [vmem:[%s5379_s5] sm:$0xff]   ;;  %v5642_v40 = vld [vmem:[#allocation70_spill] sm:$0xff]  ;;  %s3622_s5 = smov 16  }
 0x1b8   :  { %v1732_v0 = vpop.permute.xlu0 %1731 }
 0x1b9   :  { %v1148_v28 = vpop.permute.xlu1 %1147 }
 0x1ba   :  { %v1190_v51 = vsel %vm1176_vm4, %v1172_v49, %v1148_v28  ;;  %v2114_v28 = vrot.slane %v5132_v20, %v4109_v37 }
 0x1bb   :  { %3415 = vmatprep.mubr.msk.bf16.mxu1 %vm1830_vm5, %v1190_v51 }
 0x1bc   :  { %3416 = vmatmul.mubr.msk.bf16.gmra.mrb[8].mxu1 %vm1830_vm5, %v1192_v2  ;;  %v5194_v26 = vpop.permute.xlu0 %1346  ;;  %v5644_v2 = vld [vmem:[#allocation74_spill] sm:$0xff] }
 0x1bd   :  { %v1726_v43 = vpop.permute.xlu1 %1725 }
 0x1be   :  { %v1766_v31 = vsel %vm1176_vm4, %v1743_v3, %v1726_v43  ;;  %v5645_v3 = vpack.c.bf16 %v5643_v54, %v5644_v2  ;;  %v2125_v43 = vrot.slane %v5155_v19, %v4109_v37 }
 0x1bf   :  { %3375 = vmatprep.mubr.msk.bf16.mxu0 %vm1830_vm5, %v1766_v31 }
 0x1c0   :  { %v5204_v4 = vpop.permute.xlu0 %1379  ;;  %v1440_v23 = vmul.bf16 %v3191_v7, %v5645_v3 }
 0x1c1   :  { %v1728_v21 = vpop.permute.xlu1 %1727 }
 0x1c2   :  { %v1768_v50 = vsel %vm1176_vm4, %v1746_v6, %v1728_v21  ;;  %v1749_v6 = vsel %vm1151_vm3, %v5130_v45, %v5152_v39  ;;  %v3245_v21 = vcombine.low %v2125_v43, %v2136_v9  ;;  %v1752_v20 = vsel %vm1151_vm3, %v1440_v23, %v5160_v12 }
 0x1c3   :  { %3376 = vmatmul.mubr.msk.bf16.vlgmr.msra.gmra.mrb[16].mxu0 %vm1830_vm5, %v1768_v50 }
 0x1c4   :  { %3392 = vmatpush3.bf16.msra.mxu0 %v3586_v27  ;;  %v2318_v19 = vmul.bf16 %v3245_v21, %v5592_v17  ;;  %v1355_v17 = vrot.slane %v5194_v26, %v4109_v37 }
 0x1c5   :  { %v1314_v46 = vpop.permute.xlu1 %1313  ;;  %3393 = vmatprep.subr.bf16.mxu0 %v5632_v35  ;;  %v2095_v41 = vpop.permute.xlu0 %2094 }
 0x1c6   :  { %v1322_v1 = vrot.slane %v1314_v46, %v4109_v37  ;;  %v2103_v8 = vrot.slane %v2095_v41, %v4109_v37  ;;  %v1772_v46 = vsel %vm1176_vm4, %v1752_v20, %v1732_v0  ;;  %v2842_v0 = vsel %vm1151_vm3, %v2318_v19, %v5175_v47  ;;  %v5647_v41 = vld [vmem:[#allocation78_spill] sm:$0xff] }
 0x1c7   :  { %v1388_v47 = vrot.slane %v5204_v4, %v4109_v37 }
 0x1c8   :  { %v3192_v15 = vcombine.low %v1311_v63, %v1322_v1  ;;  %3394 = vmatpush3.bf16.msra.mxu0 %v5632_v35  ;;  %v3244_v31 = vcombine.low %v2103_v8, %v2114_v28  ;;  %v5646_v35 = vld [vmem:[#allocation71_spill] sm:$0xff] }
 0x1c9   :  { %3395 = vmatprep.subr.bf16.mxu0 %v5633_v61  ;;  %v5222_v57 = vpop.permute.xlu0 %2138 }
 0x1ca   :  { %v5211_v55 = vmul.bf16 %v3192_v15, %v5636_v56  ;;  %v5213_v52 = vpop.permute.xlu1 %2149  ;;  %v2317_v63 = vmul.bf16 %v3244_v31, %v5646_v35 }
 0x1cb   :  { %v2158_v54 = vrot.slane %v5213_v52, %v4109_v37 }
 0x1cc   :  { %3396 = vmatpush3.bf16.msra.mxu0 %v5633_v61 }
 0x1cd   :  { %3397 = vmatprep.subr.bf16.mxu0 %v5637_v60  ;;  %v2183_v49 = vpop.permute.xlu0 %2182 }
 0x1ce   :  { %v2191_v4 = vrot.slane %v2183_v49, %v4109_v37 }
 0x1cf   :  { %v1325_v59 = vpop.permute.xlu1 %1324 }
 0x1d0   :  { %v1333_v18 = vrot.slane %v1325_v59, %v4109_v37  ;;  %3398 = vmatpush3.bf16.msra.mxu0 %v5637_v60  ;;  %v5648_v59 = vld [vmem:[#allocation75_spill] sm:$0xff] }
 0x1d1   :  { %3399 = vmatprep.subr.bf16.mxu0 %v5638_v10  ;;  %v1710_v50 = vpop.permute.xlu0 %1709 }
 0x1d2   :  { %v3193_v32 = vcombine.low %v1333_v18, %v1344_v5  ;;  %v5649_v5 = vpack.c.bf16 %v5647_v41, %v5648_v59 }
 0x1d4   :  { %v5227_v22 = vmul.bf16 %v3193_v32, %v5641_v16  ;;  %v5229_v58 = vpop.permute.xlu1 %2160  ;;  %3400 = vmatpush3.bf16.msra.mxu0 %v5638_v10 }
 0x1d5   :  { %3401 = vmatprep.subr.bf16.mxu0 %v5642_v40  ;;  %v1712_v15 = vpop.permute.xlu0 %1711 }
 0x1d6   :  { %v1758_v52 = vsel %vm1151_vm3, %v5227_v22, %v1712_v15 }
 0x1d8   :  { %v2172_v30 = vpop.permute.xlu1 %2171  ;;  %3402 = vmatpush3.bf16.msra.mxu0 %v5642_v40  ;;  %v5651_v40 = vld [vmem:[#allocation77_spill] sm:$0xff] }
 0x1d9   :  { %v2804_v24 = vpop.permute.xlu0 %2803  ;;  %v5652_v26 = vpack.c.bf16 %v5650_v25, %v5651_v40  ;;  %v2180_v3 = vrot.slane %v2172_v30, %v4109_v37 }
 0x1dc   :  { %v2798_v51 = vpop.permute.xlu1 %2797 }
 0x1dd   :  { %v2839_v45 = vsel %vm1151_vm3, %v2317_v63, %v2798_v51  ;;  %v1736_v32 = vpop.permute.xlu0 %1735  ;;  %v2147_v51 = vrot.slane %v5222_v57, %v4109_v37 }
 0x1de   :  { %v1776_v30 = vsel %vm1176_vm4, %v1758_v52, %v1736_v32 }
 0x1df   :  { %v3246_v31 = vcombine.low %v2147_v51, %v2158_v54  ;;  %v5653_v51 = vld [vmem:[#allocation7_spill] sm:$0xff] }
 0x1e0   :  { %v1730_v27 = vpop.permute.xlu1 %1729 }
 0x1e1   :  { %v1770_v42 = vsel %vm1176_vm4, %v1749_v6, %v1730_v27  ;;  %v2227_v16 = vpop.permute.xlu0 %2226  ;;  %v2169_v6 = vrot.slane %v5229_v58, %v4109_v37  ;;  %v1755_v27 = vsel %vm1151_vm3, %v5211_v55, %v1710_v50 }
 0x1e2   :  { %3379 = vmatprep.mubr.msk.bf16.mxu0 %vm1830_vm5, %v1770_v42  ;;  %v2319_v42 = vmul.bf16 %v3246_v31, %v4602_v33 }
 0x1e3   :  { %3380 = vmatmul.mubr.msk.bf16.gmra.mrb[20].mxu0 %vm1830_vm5, %v1772_v46  ;;  %v3247_v57 = vcombine.low %v2169_v6, %v2180_v3 }
 0x1e4   :  { %v2822_v39 = vpop.permute.xlu1 %2821 }
 0x1e5   :  { %v2862_v1 = vsel %vm1176_vm4, %v2839_v45, %v2822_v39  ;;  %v5278_v28 = vpop.permute.xlu0 %2259  ;;  %v2320_v55 = vmul.bf16 %v3247_v57, %v5613_v29 }
 0x1e6   :  { %3431 = vmatprep.mubr.msk.bf16.mxu1 %vm1830_vm5, %v2862_v1 }
 0x1e7   :  { %v2848_v45 = vsel %vm1151_vm3, %v2320_v55, %v2804_v24 }
 0x1e8   :  { %v2824_v12 = vpop.permute.xlu1 %2823 }
 0x1e9   :  { %v2864_v61 = vsel %vm1176_vm4, %v2842_v0, %v2824_v12  ;;  %v2806_v43 = vpop.permute.xlu0 %2805 }
 0x1ea   :  { %3432 = vmatmul.mubr.msk.bf16.vlgmr.msra.gmra.mrb[12].mxu1 %vm1830_vm5, %v2864_v61 }
 0x1ec   :  { %v1358_v13 = vpop.permute.xlu1 %1357 }
 0x1ed   :  { %v1366_v56 = vrot.slane %v1358_v13, %v4109_v37  ;;  %v1738_v46 = vpop.permute.xlu0 %1737 }
 0x1ef   :  { %v3194_v60 = vcombine.low %v1355_v17, %v1366_v56 }
 0x1f1   :  { %v1443_v18 = vmul.bf16 %v3194_v60, %v5649_v5  ;;  %v2194_v10 = vpop.permute.xlu1 %2193  ;;  %v2830_v39 = vpop.permute.xlu0 %2829 }
 0x1f2   :  { %v2202_v2 = vrot.slane %v2194_v10, %v4109_v37  ;;  %v2235_v10 = vrot.slane %v2227_v16, %v4109_v37 }
 0x1f4   :  { %v3248_v21 = vcombine.low %v2191_v4, %v2202_v2 }
 0x1f5   :  { %v2832_v17 = vpop.permute.xlu0 %2831 }
 0x1f6   :  { %v1369_v36 = vpop.permute.xlu1 %1368  ;;  %v2321_v58 = vmul.bf16 %v3248_v21, %v4655_v44 }
 0x1f7   :  { %v1377_v11 = vrot.slane %v1369_v36, %v4109_v37 }
 0x1f8   :  { %v2851_v33 = vsel %vm1151_vm3, %v2321_v58, %v2806_v43 }
 0x1f9   :  { %v3195_v14 = vcombine.low %v1377_v11, %v1388_v47  ;;  %v2870_v44 = vsel %vm1176_vm4, %v2851_v33, %v2830_v39  ;;  %v1136_v32 = vpop.permute.xlu0 %1135 }
 0x1fa   :  { %v1178_v16 = vsel %vm1176_vm4, %v5054_v53, %v1136_v32 }
 0x1fb   :  { %v1444_v7 = vmul.bf16 %v3195_v14, %v5652_v26  ;;  %v2205_v8 = vpop.permute.xlu1 %2204 }
 0x1fc   :  { %v2213_v61 = vrot.slane %v2205_v8, %v4109_v37 }
 0x1fd   :  { %v2834_v26 = vpop.permute.xlu0 %2833 }
 0x1ff   :  { %v2216_v9 = vpop.permute.xlu1 %2215 }
 0x200   :  { %v2224_v12 = vrot.slane %v2216_v9, %v4109_v37 }
 0x201   :  { %v2836_v43 = vpop.permute.xlu0 %2835 }
 0x202   :  { %v3249_v56 = vcombine.low %v2213_v61, %v2224_v12 }
 0x203   :  { %v2802_v23 = vpop.permute.xlu1 %2801 }
 0x204   :  { %v2845_v50 = vsel %vm1151_vm3, %v2319_v42, %v2802_v23  ;;  %v2322_v41 = vmul.bf16 %v3249_v56, %v5630_v34  ;;  %v2268_v34 = vrot.slane %v5278_v28, %v4109_v37  ;;  %v5654_v28 = vld [vmem:[#allocation5_spill] sm:$0xff] }
 0x205   :  { %v377_v2 = vrot.slane %v5654_v28, %v4109_v37 }
 0x207   :  { %v1734_v20 = vpop.permute.xlu1 %1733 }
 0x208   :  { %v1774_v49 = vsel %vm1176_vm4, %v1755_v27, %v1734_v20 }
 0x209   :  { %3383 = vmatprep.mubr.msk.bf16.mxu0 %vm1830_vm5, %v1774_v49 }
 0x20a   :  { %3384 = vmatmul.mubr.msk.bf16.gmra.mrb[24].mxu0 %vm1830_vm5, %v1776_v30 }
 0x20b   :  { %v2826_v63 = vpop.permute.xlu1 %2825 }
 0x20c   :  { %v2866_v22 = vsel %vm1176_vm4, %v2845_v50, %v2826_v63 }
 0x20d   :  { %3435 = vmatprep.mubr.msk.bf16.mxu1 %vm1830_vm5, %v2866_v22 }
 0x20f   :  { %v2828_v19 = vpop.permute.xlu1 %2827 }
 0x210   :  { %v2868_v1 = vsel %vm1176_vm4, %v2848_v45, %v2828_v19 }
 0x211   :  { %3436 = vmatmul.mubr.msk.bf16.gmra.mrb[0].mxu1 %vm1830_vm5, %v2868_v1 }
 0x212   :  { %3439 = vmatprep.mubr.msk.bf16.mxu1 %vm1830_vm5, %v2870_v44 }
 0x213   :  { %v2238_v29 = vpop.permute.xlu1 %2237 }
 0x214   :  { %v2246_v59 = vrot.slane %v2238_v29, %v4109_v37 }
 0x217   :  { %v2249_v15 = vpop.permute.xlu1 %2248 }
 0x218   :  { %v2257_v11 = vrot.slane %v2249_v15, %v4109_v37 }
 0x21a   :  { %v3251_v9 = vcombine.low %v2257_v11, %v2268_v34 }
 0x21b   :  { %v1714_v0 = vpop.permute.xlu1 %1713 }
 0x21c   :  { %v1761_v13 = vsel %vm1151_vm3, %v1443_v18, %v1714_v0  ;;  %v3250_v18 = vcombine.low %v2235_v10, %v2246_v59  ;;  %v2324_v53 = vmul.bf16 %v3251_v9, %v5610_v38 }
 0x21d   :  { %v1778_v24 = vsel %vm1176_vm4, %v1761_v13, %v1738_v46 }
 0x21e   :  { %3387 = vmatprep.mubr.msk.bf16.mxu0 %vm1830_vm5, %v1778_v24  ;;  %v2323_v8 = vmul.bf16 %v3250_v18, %v5631_v48 }
 0x21f   :  { %v1716_v60 = vpop.permute.xlu1 %1715 }
 0x220   :  { %v1764_v14 = vsel %vm1151_vm3, %v1444_v7, %v1716_v60  ;;  %v389_v7 = vrot.slane %v5653_v51, %v4109_v37 }
 0x222   :  { %v3165_v23 = vcombine.low %v377_v2, %v389_v7 }
 0x223   :  { %v2808_v5 = vpop.permute.xlu1 %2807 }
 0x224   :  { %v2854_v36 = vsel %vm1151_vm3, %v2322_v41, %v2808_v5  ;;  %v583_v6 = vmul.bf16 %v3165_v23, %v5646_v35 }
 0x225   :  { %v2872_v47 = vsel %vm1176_vm4, %v2854_v36, %v2832_v17 }
 0x226   :  { %3440 = vmatmul.mubr.msk.bf16.gmra.mrb[4].mxu1 %vm1830_vm5, %v2872_v47  ;;  %v1157_v37 = vsel %vm1151_vm3, %v583_v6, %v5029_v62 }
 0x227   :  { %v1740_v25 = vpop.permute.xlu1 %1739 }
 0x228   :  { %v1780_v40 = vsel %vm1176_vm4, %v1764_v14, %v1740_v25 }
 0x229   :  { %3388 = vmatmul.mubr.msk.bf16.gmra.mrb[28].mxu0 %vm1830_vm5, %v1780_v40 }
 0x22a   :  { %3403 = vmatprep.mubr.msk.bf16.mxu0 %vm1830_vm5, %v1178_v16 }
 0x22b   :  { %v2810_v54 = vpop.permute.xlu1 %2809 }
 0x22c   :  { %v2857_v4 = vsel %vm1151_vm3, %v2323_v8, %v2810_v54 }
 0x22d   :  { %v2874_v3 = vsel %vm1176_vm4, %v2857_v4, %v2834_v26 }
 0x22e   :  { %3443 = vmatprep.mubr.msk.bf16.mxu1 %vm1830_vm5, %v2874_v3 }
 0x22f   :  { %v2812_v48 = vpop.permute.xlu1 %2811 }
 0x230   :  { %v2860_v31 = vsel %vm1151_vm3, %v2324_v53, %v2812_v48 }
 0x231   :  { %v2876_v21 = vsel %vm1176_vm4, %v2860_v31, %v2836_v43 }
 0x232   :  { %3444 = vmatmul.mubr.msk.bf16.gmra.mrb[8].mxu1 %vm1830_vm5, %v2876_v21 }
 0x233   :  { %v1138_v27 = vpop.permute.xlu1 %1137 }
 0x234   :  { %v1180_v57 = vsel %vm1176_vm4, %v1157_v37, %v1138_v27 }
 0x235   :  { %3404 = vmatmul.mubr.msk.bf16.vlgmr.msra.gmra.mrb[16].mxu0 %vm1830_vm5, %v1180_v57 }
 0x2b6   :  { %v3381_v38 = vpop.f32.mrb[20].mxu0 }
 0x2b7   :  { %v1897_v20 = vpop.f32.mrb[21].mxu0 }
 0x2b8   :  { %v3382_v52 = vpop.f32.mrb[22].mxu0 }
 0x2b9   :  { %v1900_v49 = vpop.f32.mrb[23].mxu0 }
 0x2bd   :  { %v3433_v42 = vpop.f32.mrb[12].mxu1 }
 0x2be   :  { %v2976_v30 = vpop.f32.mrb[13].mxu1 }
 0x2bf   :  { %v3434_v46 = vpop.f32.mrb[14].mxu1 }
 0x2c0   :  { %v2979_v35 = vpop.f32.mrb[15].mxu1 }
 0x2dd   :  { %v3385_v58 = vpop.f32.mrb[24].mxu0 }
 0x2de   :  { %v1913_v55 = vpop.f32.mrb[25].mxu0 }
 0x2df   :  { %v3386_v50 = vpop.f32.mrb[26].mxu0 }
 0x2e0   :  { %v1916_v63 = vpop.f32.mrb[27].mxu0 }
 0x2e4   :  { %v3437_v22 = vpop.f32.mrb[0].mxu1 }
 0x2e5   :  { %v3463_v33 = vadd.f32 %v3437_v22, %v3381_v38  ;;  %v2992_v62 = vpop.f32.mrb[1].mxu1 }
 0x2e6   :  { %v3464_v19 = vadd.f32 %v2992_v62, %v1897_v20  ;;  %v3438_v45 = vpop.f32.mrb[2].mxu1 }
 0x2e7   :  { %v3465_v39 = vadd.f32 %v3438_v45, %v3382_v52  ;;  %v2995_v1 = vpop.f32.mrb[3].mxu1 }
 0x2e8   :  { %v3466_v44 = vadd.f32 %v2995_v1, %v1900_v49 }
 0x2f9   :  { %v3441_v29 = vpop.f32.mrb[4].mxu1 }
 0x2fa   :  { %v3467_v15 = vadd.f32 %v3441_v29, %v3385_v58  ;;  %v3008_v12 = vpop.f32.mrb[5].mxu1 }
 0x2fb   :  { %v3468_v0 = vadd.f32 %v3008_v12, %v1913_v55  ;;  %v3442_v61 = vpop.f32.mrb[6].mxu1 }
 0x2fc   :  { %v3469_v13 = vadd.f32 %v3442_v61, %v3386_v50  ;;  %v3389_v24 = vpop.f32.mrb[28].mxu0  ;;  %v3011_v17 = vpop.f32.mrb[7].mxu1 }
 0x2fd   :  { %v3470_v56 = vadd.f32 %v3011_v17, %v1916_v63  ;;  %v1929_v60 = vpop.f32.mrb[29].mxu0 }
 0x2fe   :  { %v3390_v41 = vpop.f32.mrb[30].mxu0 }
 0x2ff   :  { %v1932_v59 = vpop.f32.mrb[31].mxu0 }
 0x305   :  { %v3445_v5 = vpop.f32.mrb[8].mxu1 }
 0x306   :  { %v3471_v10 = vadd.f32 %v3445_v5, %v3389_v24  ;;  %v3024_v32 = vpop.f32.mrb[9].mxu1 }
 0x307   :  { %v3472_v36 = vadd.f32 %v3024_v32, %v1929_v60  ;;  %v3446_v47 = vpop.f32.mrb[10].mxu1 }
 0x308   :  { %v3473_v18 = vadd.f32 %v3446_v47, %v3390_v41  ;;  %v3405_v11 = vpop.f32.mrb[16].mxu0  ;;  %v3027_v14 = vpop.f32.mrb[11].mxu1 }
 0x309   :  { %v3459_v25 = vadd.f32 %v3433_v42, %v3405_v11  ;;  %v3474_v34 = vadd.f32 %v3027_v14, %v1932_v59  ;;  %v2030_v40 = vpop.f32.mrb[17].mxu0 }
 0x30a   :  { %v3460_v16 = vadd.f32 %v2976_v30, %v2030_v40  ;;  %v3406_v26 = vpop.f32.mrb[18].mxu0 }
 0x30b   :  { %v3461_v8 = vadd.f32 %v3434_v46, %v3406_v26  ;;  %3075 = vrot.lane.b32.xlu1 %v3459_v25, %s3622_s5  ;;  %v2033_v9 = vpop.f32.mrb[19].mxu0 }
 0x30c   :  { %v3462_v51 = vadd.f32 %v2979_v35, %v2033_v9 }
 0x30d   :  { %3077 = vrot.lane.b32.xlu0 %v3461_v8, %s3622_s5 }
 0x30f   :  { %3071 = vrot.lane.b32.xlu1 %v3460_v16, %s3622_s5 }
 0x311   :  { %3073 = vrot.lane.b32.xlu0 %v3462_v51, %s3622_s5 }
 0x313   :  { %3083 = vrot.lane.b32.xlu1 %v3463_v33, %s3622_s5 }
 0x315   :  { %3085 = vrot.lane.b32.xlu0 %v3465_v39, %s3622_s5 }
 0x317   :  { %3079 = vrot.lane.b32.xlu1 %v3464_v19, %s3622_s5 }
 0x319   :  { %3081 = vrot.lane.b32.xlu0 %v3466_v44, %s3622_s5 }
 0x31b   :  { %3091 = vrot.lane.b32.xlu1 %v3467_v15, %s3622_s5 }
 0x31d   :  { %3093 = vrot.lane.b32.xlu0 %v3469_v13, %s3622_s5 }
 0x31f   :  { %3087 = vrot.lane.b32.xlu1 %v3468_v0, %s3622_s5 }
 0x321   :  { %3089 = vrot.lane.b32.xlu0 %v3470_v56, %s3622_s5 }
 0x323   :  { %3095 = vrot.lane.b32.xlu1 %v3472_v36, %s3622_s5 }
 0x325   :  { %3097 = vrot.lane.b32.xlu0 %v3474_v34, %s3622_s5 }
 0x327   :  { %3099 = vrot.lane.b32.xlu1 %v3471_v10, %s3622_s5 }
 0x329   :  { %3101 = vrot.lane.b32.xlu0 %v3473_v18, %s3622_s5 }
 0x37d   :  { %v3076_v7 = vpop.permute.xlu1 %3075 }
 0x37e   :  { %3122 = vst.msk [vmem:[#allocation2 + $0x10] sm:$0xff] %vm3119_vm6, %v3076_v7 }
 0x37f   :  { %v3078_v54 = vpop.permute.xlu0 %3077 }
 0x380   :  { %3123 = vst.msk [vmem:[#allocation2 + $0x18] sm:$0xff] %vm3119_vm6, %v3078_v54 }
 0x381   :  { %v3072_v4 = vpop.permute.xlu1 %3071 }
 0x382   :  { %3120 = vst.msk [vmem:[#allocation2] sm:$0xff] %vm3119_vm6, %v3072_v4 }
 0x383   :  { %v3074_v28 = vpop.permute.xlu0 %3073 }
 0x384   :  { %3121 = vst.msk [vmem:[#allocation2 + $0x8] sm:$0xff] %vm3119_vm6, %v3074_v28 }
 0x385   :  { %v3084_v2 = vpop.permute.xlu1 %3083 }
 0x386   :  { %3126 = vst.msk [vmem:[#allocation2 + $0x30] sm:$0xff] %vm3119_vm6, %v3084_v2 }
 0x387   :  { %v3086_v3 = vpop.permute.xlu0 %3085 }
 0x388   :  { %3127 = vst.msk [vmem:[#allocation2 + $0x38] sm:$0xff] %vm3119_vm6, %v3086_v3 }
 0x389   :  { %v3080_v53 = vpop.permute.xlu1 %3079 }
 0x38a   :  { %3124 = vst.msk [vmem:[#allocation2 + $0x20] sm:$0xff] %vm3119_vm6, %v3080_v53 }
 0x38b   :  { %v3082_v23 = vpop.permute.xlu0 %3081 }
 0x38c   :  { %3125 = vst.msk [vmem:[#allocation2 + $0x28] sm:$0xff] %vm3119_vm6, %v3082_v23 }
 0x38d   :  { %v3092_v48 = vpop.permute.xlu1 %3091 }
 0x38e   :  { %3130 = vst.msk [vmem:[#allocation2 + $0x50] sm:$0xff] %vm3119_vm6, %v3092_v48 }
 0x38f   :  { %v3094_v43 = vpop.permute.xlu0 %3093 }
 0x390   :  { %3131 = vst.msk [vmem:[#allocation2 + $0x58] sm:$0xff] %vm3119_vm6, %v3094_v43 }
 0x391   :  { %v3088_v31 = vpop.permute.xlu1 %3087 }
 0x392   :  { %3128 = vst.msk [vmem:[#allocation2 + $0x40] sm:$0xff] %vm3119_vm6, %v3088_v31 }
 0x393   :  { %v3090_v6 = vpop.permute.xlu0 %3089 }
 0x394   :  { %3129 = vst.msk [vmem:[#allocation2 + $0x48] sm:$0xff] %vm3119_vm6, %v3090_v6 }
 0x395   :  { %v3096_v21 = vpop.permute.xlu1 %3095 }
 0x396   :  { %3132 = vst.msk [vmem:[#allocation2 + $0x60] sm:$0xff] %vm3119_vm6, %v3096_v21 }
 0x397   :  { %v3098_v37 = vpop.permute.xlu0 %3097 }
 0x398   :  { %3133 = vst.msk [vmem:[#allocation2 + $0x68] sm:$0xff] %vm3119_vm6, %v3098_v37 }
 0x399   :  { %v3100_v27 = vpop.permute.xlu1 %3099 }
 0x39a   :  { %3134 = vst.msk [vmem:[#allocation2 + $0x70] sm:$0xff] %vm3119_vm6, %v3100_v27 }
 0x39b   :  { %v3102_v57 = vpop.permute.xlu0 %3101 }
 0x39c   :  { %3135 = vst.msk [vmem:[#allocation2 + $0x78] sm:$0xff] %vm3119_vm6, %v3102_v57 }
 0x39d   :  { %3598 = shalt.err (!%p3595_p4)
}
 0x39e   :  { %s3599_s13 = scalar_lea.hbm %s5381_s7, 2048 }
 0x39f   :  { %p3600_p5 = scmp.ne.s32.totalorder %s5381_s7, %s3599_s13  ;;  %p3603_p6 = scmp.lt.u32.totalorder %s3599_s13, %s5381_s7 }
 0x3a1   :  { %p3605_p7 = pnand %p3603_p6, %p3600_p5 }
 0x3a3   :  { %3608 = shalt.err (!%p3605_p7)
}
 0x3a4   :  { %s3624_s18 = smov 128   ;;  %s3625_s19 = smov 8  }
 0x3a5   :  { %3147 = dma.vmem_to_hbm [thread:$0]  %s3142_s10, 2048, %s5381_s7, [#allocation3], %s3624_s18, %s3624_s18, %s3625_s19  }
 0x3a6   :  { %3609 = dma.done.wait [#allocation3], 2048  }
 0x3a7   :  { %3610 = vsyncadd [#allocation3], 4294965248 }
 0x3a8   :  { %3151 = vsyncpa [#allocation3], 1 }

</bundles_post_ra>
